<compile_context>
chip_gen: v5e
topology: v5e:2x2
jax: 0.10.0
libtpu: 0.0.40
codegen_flags: <defaults>
</compile_context>

<pallas_src>
import functools

import jax
import jax.numpy as jnp
from jax.experimental import pallas as pl
from jax.experimental.pallas import tpu as pltpu


def _patch_embed_kernel(p_ref, w_ref, b_ref, g_ref, beta_ref, o_ref, *, eps):
    # p_ref: (block_m, KH*KW*C) im2col patches; w_ref: (KH*KW*C, E)
    y = jnp.dot(p_ref[...], w_ref[...], preferred_element_type=jnp.float32)
    y = y + b_ref[...]                               # conv bias, broadcast over rows
    # Fused LayerNorm over the embedding dim (torch default eps = 1e-5).
    mean = jnp.mean(y, axis=-1, keepdims=True)
    yc = y - mean
    var = jnp.mean(yc * yc, axis=-1, keepdims=True)
    inv = jax.lax.rsqrt(var + eps)                   # EUP rsqrt (free slot)
    o_ref[...] = (yc * inv * g_ref[...] + beta_ref[...]).astype(o_ref.dtype)


def patch_embed(x, conv_w, conv_b, ln_gamma, ln_beta, *,
                patch_size=4, block_m=256, eps=1e-5):
    """DaViT PatchEmbed forward for 4-D (B, C, H, W) input with patch_size == 4.

    conv_w: (embed_dim, in_chans, 7, 7)   (torch Conv2d weight layout)
    Returns (tokens, (Ho, Wo)) with tokens: (B, Ho*Wo, embed_dim).
    """
    # TODO(synk): the 3-D token-input / patch_size==2 (stage downsample) branch
    # of the PyTorch module is not implemented; only the 4-D stem path is.
    B, C, H, W = x.shape
    E, Cin, KH, KW = conv_w.shape
    assert Cin == C and patch_size == 4 and (KH, KW) == (7, 7)
    stride = patch_size
    pad = 3

    # Module semantics: pad H, W up to multiples of patch_size (zeros on right/bottom).
    pad_h = (-H) % patch_size
    pad_w = (-W) % patch_size
    x = jnp.pad(x, ((0, 0), (0, 0), (0, pad_h), (0, pad_w)))
    H += pad_h
    W += pad_w
    Ho = (H + 2 * pad - KH) // stride + 1
    Wo = (W + 2 * pad - KW) // stride + 1

    # im2col (pure layout plumbing in the wrapper): feature order is (kh, kw, c).
    xp = jnp.pad(x.transpose(0, 2, 3, 1),                       # NHWC
                 ((0, 0), (pad, pad), (pad, pad), (0, 0)))
    cols = [xp[:, kh:kh + stride * (Ho - 1) + 1:stride,
               kw:kw + stride * (Wo - 1) + 1:stride, :]
            for kh in range(KH) for kw in range(KW)]
    patches = jnp.concatenate(cols, axis=-1)                    # (B, Ho, Wo, KH*KW*C)
    Kdim = KH * KW * C
    M = B * Ho * Wo
    patches = patches.reshape(M, Kdim)

    # Pad the flattened batch*spatial axis up to a multiple of block_m.
    Mp = pl.cdiv(M, block_m) * block_m
    if Mp != M:
        patches = jnp.pad(patches, ((0, Mp - M), (0, 0)))

    # Conv weight -> (KH*KW*C, E), matching the patch feature order (kh, kw, c).
    w2 = conv_w.transpose(2, 3, 1, 0).reshape(Kdim, E)
    b2 = conv_b.reshape(1, E)
    g2 = ln_gamma.reshape(1, E)
    beta2 = ln_beta.reshape(1, E)

    kernel = functools.partial(_patch_embed_kernel, eps=eps)
    out = pl.pallas_call(
        kernel,
        out_shape=jax.ShapeDtypeStruct((Mp, E), x.dtype),
        grid_spec=pltpu.PrefetchScalarGridSpec(
            num_scalar_prefetch=0,
            grid=(Mp // block_m,),
            in_specs=[
                pl.BlockSpec((block_m, Kdim), lambda i: (i, 0)),   # patches slab
                pl.BlockSpec((Kdim, E), lambda i: (0, 0)),         # conv weight
                pl.BlockSpec((1, E), lambda i: (0, 0)),            # conv bias
                pl.BlockSpec((1, E), lambda i: (0, 0)),            # LN gamma
                pl.BlockSpec((1, E), lambda i: (0, 0)),            # LN beta
            ],
            out_specs=pl.BlockSpec((block_m, E), lambda i: (i, 0)),
        ),
        compiler_params=pltpu.CompilerParams(
            dimension_semantics=("parallel",)),
    )(patches, w2, b2, g2, beta2)

    out = out[:M].reshape(B, Ho * Wo, E)
    return out, (Ho, Wo)


def patch_embed_ref(x, conv_w, conv_b, ln_gamma, ln_beta, *,
                    patch_size=4, eps=1e-5):
    """Plain-JAX reference mirroring the PyTorch forward (4-D input path)."""
    B, C, H, W = x.shape
    pad_h = (-H) % patch_size
    pad_w = (-W) % patch_size
    x = jnp.pad(x, ((0, 0), (0, 0), (0, pad_h), (0, pad_w)))
    y = jax.lax.conv_general_dilated(
        x, conv_w, window_strides=(patch_size, patch_size),
        padding=((3, 3), (3, 3)),
        dimension_numbers=('NCHW', 'OIHW', 'NCHW'))
    y = y + conv_b[None, :, None, None]
    B, E, Ho, Wo = y.shape
    y = y.reshape(B, E, Ho * Wo).transpose(0, 2, 1)             # (B, HW, E)
    mean = jnp.mean(y, axis=-1, keepdims=True)
    var = jnp.mean((y - mean) ** 2, axis=-1, keepdims=True)
    y = (y - mean) * jax.lax.rsqrt(var + eps) * ln_gamma + ln_beta
    return y, (Ho, Wo)


if __name__ == "__main__":
    # Stem config: patch_size=4, in_chans=3, embed_dim=96, 4-D image input.
    B, C, H, W = 8, 3, 32, 32
    embed_dim = 96
    patch_size = 4

    key = jax.random.PRNGKey(0)
    kx, kw, kb, kg, kbe = jax.random.split(key, 5)
    x = jax.random.normal(kx, (B, C, H, W), dtype=jnp.float32)
    conv_w = jax.random.normal(kw, (embed_dim, C, 7, 7), dtype=jnp.float32) * 0.05
    conv_b = jax.random.normal(kb, (embed_dim,), dtype=jnp.float32) * 0.05
    ln_gamma = 1.0 + 0.1 * jax.random.normal(kg, (embed_dim,), dtype=jnp.float32)
    ln_beta = 0.05 * jax.random.normal(kbe, (embed_dim,), dtype=jnp.float32)

    out, newsize = patch_embed(x, conv_w, conv_b, ln_gamma, ln_beta,
                               patch_size=patch_size, block_m=256)
    out = jax.block_until_ready(out)

    ref, ref_size = patch_embed_ref(x, conv_w, conv_b, ln_gamma, ln_beta,
                                    patch_size=patch_size)
    assert newsize == ref_size == (H // patch_size, W // patch_size)
    assert out.shape == (B, (H // patch_size) * (W // patch_size), embed_dim)
    assert jnp.allclose(out, ref, atol=1e-4, rtol=1e-4), "mismatch vs reference"

    print("KERNEL_OK")
</pallas_src>

<mosaic_0001>
module attributes {stable_mosaic.version = 11 : i64} {
  func.func @_patch_embed_kernel(%arg0: i32, %arg1: memref<256x147xf32, #tpu.memory_space<vmem>>, %arg2: memref<147x96xf32, #tpu.memory_space<vmem>>, %arg3: memref<1x96xf32, #tpu.memory_space<vmem>>, %arg4: memref<1x96xf32, #tpu.memory_space<vmem>>, %arg5: memref<1x96xf32, #tpu.memory_space<vmem>>, %arg6: memref<256x96xf32, #tpu.memory_space<vmem>>) attributes {dimension_semantics = [#tpu.dimension_semantics<parallel>], iteration_bounds = array<i64: 2>, scalar_prefetch = 0 : i64, scratch_operands = 0 : i64, tpu.core_type = #tpu.core_type<tc>, window_params = [{transform_indices = @transform_0, window_bounds = array<i64: 256, 147>}, {pipeline_mode = #tpu.pipeline_mode<synchronous>, transform_indices = @transform_1, window_bounds = array<i64: 147, 96>}, {pipeline_mode = #tpu.pipeline_mode<synchronous>, transform_indices = @transform_2, window_bounds = array<i64: 1, 96>}, {pipeline_mode = #tpu.pipeline_mode<synchronous>, transform_indices = @transform_3, window_bounds = array<i64: 1, 96>}, {pipeline_mode = #tpu.pipeline_mode<synchronous>, transform_indices = @transform_4, window_bounds = array<i64: 1, 96>}, {transform_indices = @transform_5, window_bounds = array<i64: 256, 96>}]} {
    %c0 = arith.constant 0 : index
    %c0_0 = arith.constant 0 : index
    %0 = vector.load %arg1[%c0, %c0_0] : memref<256x147xf32, #tpu.memory_space<vmem>>, vector<256x147xf32>
    %c0_1 = arith.constant 0 : index
    %c0_2 = arith.constant 0 : index
    %1 = vector.load %arg2[%c0_1, %c0_2] : memref<147x96xf32, #tpu.memory_space<vmem>>, vector<147x96xf32>
    %cst = arith.constant dense<0.000000e+00> : vector<256x96xf32>
    %2 = tpu.matmul %0, %1, %cst {dimension_numbers = #tpu.dot_dimension_numbers<[1], [0], [0], [1], [0, 0, 1, 1], [], []>} : vector<256x147xf32>, vector<147x96xf32>, vector<256x96xf32> -> vector<256x96xf32>
    %c0_3 = arith.constant 0 : index
    %c0_4 = arith.constant 0 : index
    %3 = vector.load %arg3[%c0_3, %c0_4] : memref<1x96xf32, #tpu.memory_space<vmem>>, vector<1x96xf32>
    %4 = vector.broadcast %3 : vector<1x96xf32> to vector<256x96xf32>
    %5 = arith.addf %2, %4 : vector<256x96xf32>
    %cst_5 = arith.constant dense<0.000000e+00> : vector<256xf32>
    %6 = vector.multi_reduction <add>, %5, %cst_5 [1] : vector<256x96xf32> to vector<256xf32>
    %7 = vector.shape_cast %6 : vector<256xf32> to vector<256x1xf32>
    %cst_6 = arith.constant 9.600000e+01 : f32
    %8 = vector.broadcast %cst_6 : f32 to vector<256x1xf32>
    %9 = arith.divf %7, %8 : vector<256x1xf32>
    %10 = vector.broadcast %9 : vector<256x1xf32> to vector<256x96xf32>
    %11 = arith.subf %5, %10 : vector<256x96xf32>
    %12 = arith.mulf %11, %11 : vector<256x96xf32>
    %cst_7 = arith.constant dense<0.000000e+00> : vector<256xf32>
    %13 = vector.multi_reduction <add>, %12, %cst_7 [1] : vector<256x96xf32> to vector<256xf32>
    %14 = vector.shape_cast %13 : vector<256xf32> to vector<256x1xf32>
    %cst_8 = arith.constant 9.600000e+01 : f32
    %15 = vector.broadcast %cst_8 : f32 to vector<256x1xf32>
    %16 = arith.divf %14, %15 : vector<256x1xf32>
    %cst_9 = arith.constant 9.99999974E-6 : f32
    %17 = vector.broadcast %cst_9 : f32 to vector<256x1xf32>
    %18 = arith.addf %16, %17 : vector<256x1xf32>
    %19 = math.rsqrt %18 : vector<256x1xf32>
    %20 = vector.broadcast %19 : vector<256x1xf32> to vector<256x96xf32>
    %21 = arith.mulf %11, %20 : vector<256x96xf32>
    %c0_10 = arith.constant 0 : index
    %c0_11 = arith.constant 0 : index
    %22 = vector.load %arg4[%c0_10, %c0_11] : memref<1x96xf32, #tpu.memory_space<vmem>>, vector<1x96xf32>
    %23 = vector.broadcast %22 : vector<1x96xf32> to vector<256x96xf32>
    %24 = arith.mulf %21, %23 : vector<256x96xf32>
    %c0_12 = arith.constant 0 : index
    %c0_13 = arith.constant 0 : index
    %25 = vector.load %arg5[%c0_12, %c0_13] : memref<1x96xf32, #tpu.memory_space<vmem>>, vector<1x96xf32>
    %26 = vector.broadcast %25 : vector<1x96xf32> to vector<256x96xf32>
    %27 = arith.addf %24, %26 : vector<256x96xf32>
    %c0_14 = arith.constant 0 : index
    %c0_15 = arith.constant 0 : index
    %28 = vector.load %arg6[%c0_14, %c0_15] : memref<256x96xf32, #tpu.memory_space<vmem>>, vector<256x96xf32>
    tpu.vector_store %arg6[%c0_14, %c0_15], %27 {strides = array<i32>} : memref<256x96xf32, #tpu.memory_space<vmem>>, vector<256x96xf32>,
    return
  }
  func.func @transform_0(%arg0: i32) -> (i32, i32) {
    %c0_i32 = arith.constant 0 : i32
    %c0_i32_0 = arith.constant 0 : i32
    return %arg0, %c0_i32 : i32, i32
  }
  func.func @transform_1(%arg0: i32) -> (i32, i32) {
    %c0_i32 = arith.constant 0 : i32
    %c0_i32_0 = arith.constant 0 : i32
    %c0_i32_1 = arith.constant 0 : i32
    return %c0_i32, %c0_i32_0 : i32, i32
  }
  func.func @transform_2(%arg0: i32) -> (i32, i32) {
    %c0_i32 = arith.constant 0 : i32
    %c0_i32_0 = arith.constant 0 : i32
    %c0_i32_1 = arith.constant 0 : i32
    return %c0_i32, %c0_i32_0 : i32, i32
  }
  func.func @transform_3(%arg0: i32) -> (i32, i32) {
    %c0_i32 = arith.constant 0 : i32
    %c0_i32_0 = arith.constant 0 : i32
    %c0_i32_1 = arith.constant 0 : i32
    return %c0_i32, %c0_i32_0 : i32, i32
  }
  func.func @transform_4(%arg0: i32) -> (i32, i32) {
    %c0_i32 = arith.constant 0 : i32
    %c0_i32_0 = arith.constant 0 : i32
    %c0_i32_1 = arith.constant 0 : i32
    return %c0_i32, %c0_i32_0 : i32, i32
  }
  func.func @transform_5(%arg0: i32) -> (i32, i32) {
    %c0_i32 = arith.constant 0 : i32
    %c0_i32_0 = arith.constant 0 : i32
    return %arg0, %c0_i32 : i32, i32
  }
}

</mosaic_0001>

<bundles_post_ra>
// kernel: tpu_custom_call.1
= control target key start
LH: loop header
LB: loop body
LE: loop exit
PB: predicated region body
PF: predicated region fallthrough
CT: control target
= control target key end

     0   :  { %s1717_s18 = smov 0   ;;  %s2692_s0 = inlined_call_operand.vmem [shape: f32[512,147], index: 0, kind: input, shape index: {}]   ;;  %s2693_s1 = inlined_call_operand.vmem [shape: f32[147,96], index: 1, kind: input, shape index: {}]   ;;  %s2694_s2 = inlined_call_operand.vmem [shape: f32[1,96], index: 2, kind: input, shape index: {}]   ;;  %s2695_s3 = inlined_call_operand.vmem [shape: f32[1,96], index: 3, kind: input, shape index: {}]   ;;  %s2696_s4 = inlined_call_operand.vmem [shape: f32[1,96], index: 4, kind: input, shape index: {}]   ;;  %s2697_s5 = inlined_call_operand.vmem [shape: f32[512,96], index: 5, kind: output, shape index: {}]  }
   0x1 LB: > { %s1517_s19 = sadd.s32 4294967295, %s1684_s18   ;;  %p1521_p0 = scmp.ge.s32.totalorder %s1684_s18, 1  ;;  %s1684_s18 = sphi %s1717_s18, %s15_s18  }
   0x2   : > { %p189_p1 = scmp.lt.s32.totalorder %s1684_s18, 3 }
   0x4   : > { %p190_p2 = pnand %p1521_p0, %p189_p1 }
   0x5   : > { %s1522_s26 = sshll.u32 (!%p190_p2), %s1517_s19, 5 }
   0x6   : > { %193 = sbr.rel (%p190_p2) target bundleno = 574 (0x23e), region = 40  ;;  %p219_p3 = scmp.lt.s32.totalorder (!%p190_p2), %s1522_s26, 63 }
   0xb   : > { %v310_v0 = vld [vmem:[%s2693_s1 + $0x78] sm:$0xff]  ;;  %v309_v1 = vld [vmem:[%s2693_s1 + $0x70] sm:$0xff]  ;;  %vm415_vm0 = vcmask 1042432   ;;  %v1739_v3 = vld [vmem:[%s2693_s1 + $0x88] sm:$0xff]  ;;  %s2699_s26 = smov (!%p219_p3, %s1522_s26), 63  ;;  %vm318_vm1 = vcmask 154624  }
   0xc   : > { %v1734_v2 = vld [vmem:[%s2693_s1 + $0x90] sm:$0x7]  ;;  %419 = vmatpush.msra.mxu0 %v310_v0  ;;  %1563 = vmatpush.msra.mxu2 %v310_v0  ;;  %v308_v4 = vld [vmem:[%s2693_s1 + $0x68] sm:$0xff]  ;;  %v1749_v5 = vld [vmem:[%s2693_s1 + $0x80] sm:$0xff]  ;;  %s1562_s10 = sshll.u32 %s2699_s26, 4  ;;  %vm645_vm2 = vcmask 785408  }
   0xd   : > { %1564 = vmatpush.msra.mxu3 %v310_v0  ;;  %1527 = vmatpush.msk.msra.mxu1 %vm415_vm0, %v1734_v2  ;;  %v307_v6 = vld [vmem:[%s2693_s1 + $0x60] sm:$0xff]  ;;  %s1762_s13 = scalar_lea.vmem %s2692_s0, %s1562_s10  ;;  %v306_v7 = vld [vmem:[%s2693_s1 + $0x58] sm:$0xff]  ;;  %v305_v9 = vld [vmem:[%s2693_s1 + $0x50] sm:$0xff]  ;;  %s1526_s20 = sshll.u32 %s2699_s26, 3 }
   0xe   : > { %420 = vmatpush.msra.mxu0 %v309_v1  ;;  %1565 = vmatpush.msra.mxu2 %v309_v1  ;;  %v232_v8 = vld [vmem:[%s1762_s13 + $0x8] sm:$0xff]  ;;  %v303_v11 = vld [vmem:[%s2693_s1 + $0x40] sm:$0xff]  ;;  %v234_v12 = vld [vmem:[%s1762_s13 + $0x18] sm:$0xff]  ;;  %s2335_s24 = scalar_lea.vmem %s2697_s5, %s1526_s20 }
   0xf   : > { %1566 = vmatpush.msra.mxu3 %v309_v1  ;;  %546 = vmatpush.msra.mxu1 %v1739_v3  ;;  %v304_v10 = vld [vmem:[%s2693_s1 + $0x48] sm:$0xff]  ;;  %v302_v13 = vld [vmem:[%s2693_s1 + $0x38] sm:$0xff]  ;;  %v301_v14 = vld [vmem:[%s2693_s1 + $0x30] sm:$0xff] }
  0x10   : > { %421 = vmatpush.msra.mxu0 %v308_v4  ;;  %1567 = vmatpush.msra.mxu2 %v308_v4  ;;  %v300_v15 = vld [vmem:[%s2693_s1 + $0x28] sm:$0xff]  ;;  %v299_v16 = vld [vmem:[%s2693_s1 + $0x20] sm:$0xff]  ;;  %v298_v18 = vld [vmem:[%s2693_s1 + $0x18] sm:$0xff] }
  0x11   : > { %1568 = vmatpush.msra.mxu3 %v308_v4  ;;  %547 = vmatpush.msra.mxu1 %v1749_v5  ;;  %v236_v17 = vld [vmem:[%s1762_s13 + $0x28] sm:$0xff]  ;;  %v297_v19 = vld [vmem:[%s2693_s1 + $0x10] sm:$0xff]  ;;  %v295_v21 = vld [vmem:[%s2693_s1] sm:$0xff] }
  0x12   : > { %422 = vmatpush.msra.mxu0 %v307_v6  ;;  %1569 = vmatpush.msra.mxu2 %v307_v6  ;;  %v296_v20 = vld [vmem:[%s2693_s1 + $0x8] sm:$0xff]  ;;  %v231_v22 = vld [vmem:[%s1762_s13] sm:$0xff]  ;;  %v261_v23 = vld [vmem:[%s1762_s13 + $0xf0] sm:$0xff] }
  0x13   : > { %1570 = vmatpush.msra.mxu3 %v307_v6  ;;  %1528 = vmatmul.msk.f32.vlgmr.msra.gmra.mxu1 %vm318_vm1, %v232_v8  ;;  %v293_v24 = vld [vmem:[%s1762_s13 + $0x1f0] sm:$0xff]  ;;  %v238_v25 = vld [vmem:[%s1762_s13 + $0x38] sm:$0xff]  ;;  %v263_v27 = vld [vmem:[%s1762_s13 + $0x100] sm:$0xff] }
  0x14   : > { %423 = vmatpush.msra.mxu0 %v306_v7  ;;  %1571 = vmatpush.msra.mxu2 %v306_v7  ;;  %v233_v26 = vld [vmem:[%s1762_s13 + $0x10] sm:$0xff]  ;;  %v268_v28 = vld [vmem:[%s1762_s13 + $0x128] sm:$0xff]  ;;  %v235_v30 = vld [vmem:[%s1762_s13 + $0x20] sm:$0xff] }
  0x15   : > { %1572 = vmatpush.msra.mxu3 %v306_v7  ;;  %v240_v29 = vld [vmem:[%s1762_s13 + $0x48] sm:$0xff]  ;;  %v265_v31 = vld [vmem:[%s1762_s13 + $0x110] sm:$0xff]  ;;  %v270_v32 = vld [vmem:[%s1762_s13 + $0x138] sm:$0xff] }
  0x16   : > { %424 = vmatpush.msra.mxu0 %v305_v9  ;;  %1573 = vmatpush.msra.mxu2 %v305_v9  ;;  %v242_v33 = vld [vmem:[%s1762_s13 + $0x58] sm:$0xff]  ;;  %v237_v34 = vld [vmem:[%s1762_s13 + $0x30] sm:$0xff]  ;;  %v267_v35 = vld [vmem:[%s1762_s13 + $0x120] sm:$0xff] }
  0x17   : > { %1574 = vmatpush.msra.mxu3 %v305_v9  ;;  %v272_v36 = vld [vmem:[%s1762_s13 + $0x148] sm:$0xff]  ;;  %v239_v38 = vld [vmem:[%s1762_s13 + $0x40] sm:$0xff]  ;;  %v269_v39 = vld [vmem:[%s1762_s13 + $0x130] sm:$0xff] }
  0x18   : > { %425 = vmatpush.msra.mxu0 %v304_v10  ;;  %1575 = vmatpush.msra.mxu2 %v304_v10  ;;  %v244_v37 = vld [vmem:[%s1762_s13 + $0x68] sm:$0xff]  ;;  %v274_v40 = vld [vmem:[%s1762_s13 + $0x158] sm:$0xff]  ;;  %v241_v42 = vld [vmem:[%s1762_s13 + $0x50] sm:$0xff] }
  0x19   : > { %1576 = vmatpush.msra.mxu3 %v304_v10  ;;  %v246_v41 = vld [vmem:[%s1762_s13 + $0x78] sm:$0xff]  ;;  %v271_v43 = vld [vmem:[%s1762_s13 + $0x140] sm:$0xff]  ;;  %v276_v44 = vld [vmem:[%s1762_s13 + $0x168] sm:$0xff] }
  0x1a   : > { %426 = vmatpush.msra.mxu0 %v303_v11  ;;  %1577 = vmatpush.msra.mxu2 %v303_v11  ;;  %v248_v45 = vld [vmem:[%s1762_s13 + $0x88] sm:$0xff]  ;;  %v243_v46 = vld [vmem:[%s1762_s13 + $0x60] sm:$0xff]  ;;  %v273_v47 = vld [vmem:[%s1762_s13 + $0x150] sm:$0xff] }
  0x1b   : > { %1578 = vmatpush.msra.mxu3 %v303_v11  ;;  %1529 = vmatmul.msk.f32.gmra.mxu1 %vm318_vm1, %v234_v12  ;;  %v278_v48 = vld [vmem:[%s1762_s13 + $0x178] sm:$0xff]  ;;  %v245_v50 = vld [vmem:[%s1762_s13 + $0x70] sm:$0xff]  ;;  %v275_v51 = vld [vmem:[%s1762_s13 + $0x160] sm:$0xff] }
  0x1c   : > { %427 = vmatpush.msra.mxu0 %v302_v13  ;;  %1579 = vmatpush.msra.mxu2 %v302_v13  ;;  %v250_v49 = vld [vmem:[%s1762_s13 + $0x98] sm:$0xff]  ;;  %v280_v52 = vld [vmem:[%s1762_s13 + $0x188] sm:$0xff]  ;;  %v247_v54 = vld [vmem:[%s1762_s13 + $0x80] sm:$0xff] }
  0x1d   : > { %1580 = vmatpush.msra.mxu3 %v302_v13  ;;  %v252_v53 = vld [vmem:[%s1762_s13 + $0xa8] sm:$0xff]  ;;  %v277_v55 = vld [vmem:[%s1762_s13 + $0x170] sm:$0xff]  ;;  %v282_v56 = vld [vmem:[%s1762_s13 + $0x198] sm:$0xff] }
  0x1e   : > { %428 = vmatpush.msra.mxu0 %v301_v14  ;;  %1581 = vmatpush.msra.mxu2 %v301_v14  ;;  %v254_v57 = vld [vmem:[%s1762_s13 + $0xb8] sm:$0xff]  ;;  %v249_v58 = vld [vmem:[%s1762_s13 + $0x90] sm:$0xff]  ;;  %v279_v59 = vld [vmem:[%s1762_s13 + $0x180] sm:$0xff] }
  0x1f   : > { %1582 = vmatpush.msra.mxu3 %v301_v14  ;;  %v284_v60 = vld [vmem:[%s1762_s13 + $0x1a8] sm:$0xff]  ;;  %v251_v62 = vld [vmem:[%s1762_s13 + $0xa0] sm:$0xff]  ;;  %v281_v63 = vld [vmem:[%s1762_s13 + $0x190] sm:$0xff] }
  0x20   : > { %429 = vmatpush.msra.mxu0 %v300_v15  ;;  %1583 = vmatpush.msra.mxu2 %v300_v15  ;;  %v256_v61 = vld [vmem:[%s1762_s13 + $0xc8] sm:$0xff]  ;;  %v286_v0 = vld [vmem:[%s1762_s13 + $0x1b8] sm:$0xff]  ;;  %v255_v6 = vld [vmem:[%s1762_s13 + $0xc0] sm:$0xff] }
  0x21   : > { %1584 = vmatpush.msra.mxu3 %v300_v15  ;;  %v258_v1 = vld [vmem:[%s1762_s13 + $0xd8] sm:$0xff]  ;;  %v288_v4 = vld [vmem:[%s1762_s13 + $0x1c8] sm:$0xff]  ;;  %v285_v7 = vld [vmem:[%s1762_s13 + $0x1b0] sm:$0xff] }
  0x22   : > { %430 = vmatpush.msra.mxu0 %v299_v16  ;;  %1585 = vmatpush.msra.mxu2 %v299_v16  ;;  %v290_v8 = vld [vmem:[%s1762_s13 + $0x1d8] sm:$0xff]  ;;  %v257_v11 = vld [vmem:[%s1762_s13 + $0xd0] sm:$0xff]  ;;  %v287_v12 = vld [vmem:[%s1762_s13 + $0x1c0] sm:$0xff] }
  0x23   : > { %1586 = vmatpush.msra.mxu3 %v299_v16  ;;  %1530 = vmatmul.msk.f32.gmra.mxu1 %vm318_vm1, %v236_v17  ;;  %v262_v9 = vld [vmem:[%s1762_s13 + $0xf8] sm:$0xff]  ;;  %v292_v13 = vld [vmem:[%s1762_s13 + $0x1e8] sm:$0xff]  ;;  %v259_v16 = vld [vmem:[%s1762_s13 + $0xe0] sm:$0xff] }
  0x24   : > { %431 = vmatpush.msra.mxu0 %v298_v18  ;;  %1587 = vmatpush.msra.mxu2 %v298_v18  ;;  %v264_v14 = vld [vmem:[%s1762_s13 + $0x108] sm:$0xff]  ;;  %v289_v17 = vld [vmem:[%s1762_s13 + $0x1d0] sm:$0xff] }
  0x25   : > { %1588 = vmatpush.msra.mxu3 %v298_v18  ;;  %v294_v18 = vld [vmem:[%s1762_s13 + $0x1f8] sm:$0xff] }
  0x26   : > { %432 = vmatpush.msra.mxu0 %v297_v19  ;;  %1589 = vmatpush.msra.mxu2 %v297_v19 }
  0x27   : > { %1590 = vmatpush.msra.mxu3 %v297_v19  ;;  %v266_v19 = vld [vmem:[%s1762_s13 + $0x118] sm:$0xff] }
  0x28   : > { %433 = vmatpush.msra.mxu0 %v296_v20  ;;  %1591 = vmatpush.msra.mxu2 %v296_v20 }
  0x29   : > { %1592 = vmatpush.msra.mxu3 %v296_v20 }
  0x2a   : > { %434 = vmatpush.msra.mxu0 %v295_v21  ;;  %1593 = vmatpush.msra.mxu2 %v295_v21 }
  0x2b   : > { %1594 = vmatpush.msra.mxu3 %v295_v21  ;;  %435 = vmatmul.f32.vlgmr.msra.gmra.mxu0 %v231_v22  ;;  %v291_v21 = vld [vmem:[%s1762_s13 + $0x1e0] sm:$0xff] }
  0x2c   : > { %480 = vmatmul.f32.vlgmr.msra.gmra.mxu2 %v261_v23  ;;  %528 = vmatmul.f32.vlgmr.msra.gmra.mxu3 %v293_v24  ;;  %v1903_v22 = vld [vmem:[%s2694_s2] ss:$0 sm:$0xff] }
  0x2d   : > { %1531 = vmatmul.msk.f32.gmra.mxu1 %vm318_vm1, %v238_v25  ;;  %1595 = vmatpush.msk.msrb.mxu3 %vm415_vm0, %v1734_v2  ;;  %v253_v2 = vld [vmem:[%s1762_s13 + $0xb0] sm:$0xff] }
  0x2f   : > { %1596 = vmatpush.msrb.mxu3 %v1739_v3  ;;  %v283_v3 = vld [vmem:[%s1762_s13 + $0x1a0] sm:$0xff] }
  0x31   : > { %1597 = vmatpush.msrb.mxu3 %v1749_v5  ;;  %v260_v5 = vld [vmem:[%s1762_s13 + $0xe8] sm:$0xff] }
  0x33   : > { %438 = vmatmul.f32.gmra.mxu0 %v233_v26 }
  0x34   : > { %483 = vmatmul.f32.gmra.mxu2 %v263_v27  ;;  %1546 = vmatmul.msk.f32.vlgmr.msrb.gmra.mxu3 %vm318_vm1, %v268_v28 }
  0x35   : > { %1532 = vmatmul.msk.f32.gmra.mxu1 %vm318_vm1, %v240_v29 }
  0x3b   : > { %441 = vmatmul.f32.gmra.mxu0 %v235_v30 }
  0x3c   : > { %486 = vmatmul.f32.gmra.mxu2 %v265_v31  ;;  %1547 = vmatmul.msk.f32.gmra.mxu3 %vm318_vm1, %v270_v32 }
  0x3d   : > { %1533 = vmatmul.msk.f32.gmra.mxu1 %vm318_vm1, %v242_v33 }
  0x43   : > { %444 = vmatmul.f32.gmra.mxu0 %v237_v34 }
  0x44   : > { %489 = vmatmul.f32.gmra.mxu2 %v267_v35  ;;  %1548 = vmatmul.msk.f32.gmra.mxu3 %vm318_vm1, %v272_v36 }
  0x45   : > { %1534 = vmatmul.msk.f32.gmra.mxu1 %vm318_vm1, %v244_v37 }
  0x4b   : > { %447 = vmatmul.f32.gmra.mxu0 %v239_v38 }
  0x4c   : > { %492 = vmatmul.f32.gmra.mxu2 %v269_v39  ;;  %1549 = vmatmul.msk.f32.gmra.mxu3 %vm318_vm1, %v274_v40 }
  0x4d   : > { %1535 = vmatmul.msk.f32.gmra.mxu1 %vm318_vm1, %v246_v41 }
  0x53   : > { %450 = vmatmul.f32.gmra.mxu0 %v241_v42 }
  0x54   : > { %495 = vmatmul.f32.gmra.mxu2 %v271_v43  ;;  %1550 = vmatmul.msk.f32.gmra.mxu3 %vm318_vm1, %v276_v44 }
  0x55   : > { %1536 = vmatmul.msk.f32.gmra.mxu1 %vm318_vm1, %v248_v45 }
  0x5b   : > { %453 = vmatmul.f32.gmra.mxu0 %v243_v46 }
  0x5c   : > { %498 = vmatmul.f32.gmra.mxu2 %v273_v47  ;;  %1551 = vmatmul.msk.f32.gmra.mxu3 %vm318_vm1, %v278_v48 }
  0x5d   : > { %1537 = vmatmul.msk.f32.gmra.mxu1 %vm318_vm1, %v250_v49 }
  0x63   : > { %456 = vmatmul.f32.gmra.mxu0 %v245_v50 }
  0x64   : > { %501 = vmatmul.f32.gmra.mxu2 %v275_v51  ;;  %1552 = vmatmul.msk.f32.gmra.mxu3 %vm318_vm1, %v280_v52 }
  0x65   : > { %1538 = vmatmul.msk.f32.gmra.mxu1 %vm318_vm1, %v252_v53 }
  0x6b   : > { %459 = vmatmul.f32.gmra.mxu0 %v247_v54 }
  0x6c   : > { %504 = vmatmul.f32.gmra.mxu2 %v277_v55  ;;  %1553 = vmatmul.msk.f32.gmra.mxu3 %vm318_vm1, %v282_v56 }
  0x6d   : > { %1539 = vmatmul.msk.f32.gmra.mxu1 %vm318_vm1, %v254_v57 }
  0x73   : > { %462 = vmatmul.f32.gmra.mxu0 %v249_v58 }
  0x74   : > { %507 = vmatmul.f32.gmra.mxu2 %v279_v59  ;;  %1554 = vmatmul.msk.f32.gmra.mxu3 %vm318_vm1, %v284_v60 }
  0x75   : > { %1540 = vmatmul.msk.f32.gmra.mxu1 %vm318_vm1, %v256_v61 }
  0x7b   : > { %465 = vmatmul.f32.gmra.mxu0 %v251_v62 }
  0x7c   : > { %510 = vmatmul.f32.gmra.mxu2 %v281_v63  ;;  %1555 = vmatmul.msk.f32.gmra.mxu3 %vm318_vm1, %v286_v0 }
  0x7d   : > { %1541 = vmatmul.msk.f32.gmra.mxu1 %vm318_vm1, %v258_v1 }
  0x83   : > { %468 = vmatmul.f32.gmra.mxu0 %v253_v2 }
  0x84   : > { %513 = vmatmul.f32.gmra.mxu2 %v283_v3  ;;  %1556 = vmatmul.msk.f32.gmra.mxu3 %vm318_vm1, %v288_v4 }
  0x85   : > { %1542 = vmatmul.msk.f32.gmra.mxu1 %vm318_vm1, %v260_v5 }
  0x8b   : > { %471 = vmatmul.f32.gmra.mxu0 %v255_v6 }
  0x8c   : > { %516 = vmatmul.f32.gmra.mxu2 %v285_v7  ;;  %1557 = vmatmul.msk.f32.gmra.mxu3 %vm318_vm1, %v290_v8 }
  0x8d   : > { %1543 = vmatmul.msk.f32.gmra.mxu1 %vm318_vm1, %v262_v9 }
  0x90   : > { %v549_v10 = vpop.f32.mrf.mxu1 }
  0x93   : > { %474 = vmatmul.f32.gmra.mxu0 %v257_v11 }
  0x94   : > { %519 = vmatmul.f32.gmra.mxu2 %v287_v12  ;;  %1558 = vmatmul.msk.f32.gmra.mxu3 %vm318_vm1, %v292_v13 }
  0x95   : > { %1544 = vmatmul.msk.f32.gmra.mxu1 %vm318_vm1, %v264_v14 }
  0x98   : > { %v552_v15 = vpop.f32.mrf.mxu1 }
  0x9b   : > { %477 = vmatmul.f32.gmra.mxu0 %v259_v16 }
  0x9c   : > { %522 = vmatmul.f32.gmra.mxu2 %v289_v17  ;;  %1559 = vmatmul.msk.f32.gmra.mxu3 %vm318_vm1, %v294_v18 }
  0x9d   : > { %1545 = vmatmul.msk.f32.gmra.mxu1 %vm318_vm1, %v266_v19 }
  0xa0   : > { %v555_v20 = vpop.f32.mrf.mxu1 }
  0xa4   : > { %525 = vmatmul.f32.gmra.mxu2 %v291_v21 }
  0xa8   : > { %v436_v23 = vpop.f32.mrf.mxu0 }
  0xa9   : > { %v437_v24 = vadd.f32 %v1903_v22, %v436_v23 }
  0xaa   : > { %v558_v25 = vpop.f32.mrf.mxu1 }
  0xab   : > { %v1906_v26 = vadd.f32 %v549_v10, %v437_v24 }
  0xad   : > { %v646_v27 = vsel %vm645_vm2, %v1906_v26, 0.0 }
  0xae   : > { %647 = vadd.xlane.f32.xlu0 %v646_v27 }
  0xaf   : > { %v1910_v28 = vpop.f32.mrf.mxu2  ;;  %v1912_v29 = vpop.f32.mrf.mxu3 }
  0xb0   : > { %v439_v30 = vpop.f32.mrf.mxu0 }
  0xb1   : > { %v440_v31 = vadd.f32 %v1903_v22, %v439_v30 }
  0xb2   : > { %v561_v32 = vpop.f32.mrf.mxu1 }
  0xb3   : > { %v1915_v33 = vadd.f32 %v552_v15, %v440_v31 }
  0xb5   : > { %v649_v34 = vsel %vm645_vm2, %v1915_v33, 0.0 }
  0xb6   : > { %650 = vadd.xlane.f32.xlu0 %v649_v34 }
  0xb7   : > { %v1919_v35 = vpop.f32.mrf.mxu2  ;;  %v603_v36 = vpop.f32.mrf.mxu3 }
  0xb8   : > { %v442_v37 = vpop.f32.mrf.mxu0 }
  0xb9   : > { %v443_v38 = vadd.f32 %v1903_v22, %v442_v37 }
  0xba   : > { %v564_v39 = vpop.f32.mrf.mxu1 }
  0xbb   : > { %v1922_v40 = vadd.f32 %v555_v20, %v443_v38 }
  0xbd   : > { %v652_v41 = vsel %vm645_vm2, %v1922_v40, 0.0 }
  0xbe   : > { %653 = vadd.xlane.f32.xlu1 %v652_v41 }
  0xbf   : > { %v1926_v42 = vpop.f32.mrf.mxu2  ;;  %v606_v43 = vpop.f32.mrf.mxu3 }
  0xc0   : > { %v445_v44 = vpop.f32.mrf.mxu0 }
  0xc1   : > { %v446_v45 = vadd.f32 %v1903_v22, %v445_v44 }
  0xc2   : > { %v567_v46 = vpop.f32.mrf.mxu1 }
  0xc3   : > { %v1929_v47 = vadd.f32 %v558_v25, %v446_v45 }
  0xc5   : > { %v655_v48 = vsel %vm645_vm2, %v1929_v47, 0.0 }
  0xc6   : > { %656 = vadd.xlane.f32.xlu1 %v655_v48 }
  0xc7   : > { %v490_v49 = vpop.f32.mrf.mxu2  ;;  %v609_v50 = vpop.f32.mrf.mxu3 }
  0xc8   : > { %v491_v51 = vadd.f32 %v1903_v22, %v490_v49  ;;  %v448_v52 = vpop.f32.mrf.mxu0 }
  0xc9   : > { %v449_v53 = vadd.f32 %v1903_v22, %v448_v52 }
  0xca   : > { %v570_v54 = vpop.f32.mrf.mxu1  ;;  %v1935_v55 = vadd.f32 %v603_v36, %v491_v51 }
  0xcb   : > { %v1937_v56 = vadd.f32 %v561_v32, %v449_v53 }
  0xcc   : > { %v700_v57 = vsel %vm645_vm2, %v1935_v55, 0.0 }
  0xcd   : > { %701 = vadd.xlane.f32.xlu0 %v700_v57  ;;  %v658_v58 = vsel %vm645_vm2, %v1937_v56, 0.0 }
  0xce   : > { %659 = vadd.xlane.f32.xlu2 %v658_v58 }
  0xcf   : > { %v493_v59 = vpop.f32.mrf.mxu2  ;;  %v612_v60 = vpop.f32.mrf.mxu3 }
  0xd0   : > { %v494_v61 = vadd.f32 %v1903_v22, %v493_v59  ;;  %v451_v62 = vpop.f32.mrf.mxu0 }
  0xd1   : > { %v452_v63 = vadd.f32 %v1903_v22, %v451_v62 }
  0xd2   : > { %v573_v0 = vpop.f32.mrf.mxu1  ;;  %v1945_v1 = vadd.f32 %v606_v43, %v494_v61 }
  0xd3   : > { %v1947_v2 = vadd.f32 %v564_v39, %v452_v63 }
  0xd4   : > { %v703_v3 = vsel %vm645_vm2, %v1945_v1, 0.0 }
  0xd5   : > { %704 = vadd.xlane.f32.xlu1 %v703_v3  ;;  %v661_v4 = vsel %vm645_vm2, %v1947_v2, 0.0 }
  0xd6   : > { %662 = vadd.xlane.f32.xlu2 %v661_v4 }
  0xd7   : > { %v496_v5 = vpop.f32.mrf.mxu2  ;;  %v615_v6 = vpop.f32.mrf.mxu3 }
  0xd8   : > { %v497_v7 = vadd.f32 %v1903_v22, %v496_v5  ;;  %v454_v8 = vpop.f32.mrf.mxu0 }
  0xd9   : > { %v455_v9 = vadd.f32 %v1903_v22, %v454_v8 }
  0xda   : > { %v576_v10 = vpop.f32.mrf.mxu1  ;;  %v1955_v11 = vadd.f32 %v609_v50, %v497_v7 }
  0xdb   : > { %v1957_v12 = vadd.f32 %v567_v46, %v455_v9 }
  0xdc   : > { %v706_v13 = vsel %vm645_vm2, %v1955_v11, 0.0 }
  0xdd   : > { %v664_v14 = vsel %vm645_vm2, %v1957_v12, 0.0 }
  0xde   : > { %707 = vadd.xlane.f32.xlu2 %v706_v13  ;;  %665 = vadd.xlane.f32.xlu0 %v664_v14 }
  0xdf   : > { %v499_v15 = vpop.f32.mrf.mxu2  ;;  %v618_v16 = vpop.f32.mrf.mxu3 }
  0xe0   : > { %v500_v17 = vadd.f32 %v1903_v22, %v499_v15  ;;  %v457_v18 = vpop.f32.mrf.mxu0 }
  0xe1   : > { %v458_v19 = vadd.f32 %v1903_v22, %v457_v18 }
  0xe2   : > { %v579_v20 = vpop.f32.mrf.mxu1  ;;  %v1965_v21 = vadd.f32 %v612_v60, %v500_v17 }
  0xe3   : > { %v1967_v23 = vadd.f32 %v570_v54, %v458_v19 }
  0xe4   : > { %v709_v25 = vsel %vm645_vm2, %v1965_v21, 0.0 }
  0xe5   : > { %v667_v24 = vsel %vm645_vm2, %v1967_v23, 0.0 }
  0xe6   : > { %668 = vadd.xlane.f32.xlu1 %v667_v24  ;;  %710 = vadd.xlane.f32.xlu0 %v709_v25 }
  0xe7   : > { %v502_v27 = vpop.f32.mrf.mxu2  ;;  %v621_v30 = vpop.f32.mrf.mxu3 }
  0xe8   : > { %v503_v31 = vadd.f32 %v1903_v22, %v502_v27  ;;  %v460_v32 = vpop.f32.mrf.mxu0 }
  0xe9   : > { %v461_v34 = vadd.f32 %v1903_v22, %v460_v32 }
  0xea   : > { %v582_v36 = vpop.f32.mrf.mxu1  ;;  %v1975_v37 = vadd.f32 %v615_v6, %v503_v31 }
  0xeb   : > { %v1977_v38 = vadd.f32 %v573_v0, %v461_v34  ;;  %v1686_v34 = vmov 96.0  }
  0xec   : > { %v712_v41 = vsel %vm645_vm2, %v1975_v37, 0.0  ;;  %1610 = vrcp.f32 %v1686_v34 }
  0xed   : > { %v670_v39 = vsel %vm645_vm2, %v1977_v38, 0.0 }
  0xee   : > { %671 = vadd.xlane.f32.xlu2 %v670_v39  ;;  %713 = vadd.xlane.f32.xlu1 %v712_v41 }
  0xef   : > { %v505_v43 = vpop.f32.mrf.mxu2  ;;  %v624_v44 = vpop.f32.mrf.mxu3 }
  0xf0   : > { %v506_v45 = vadd.f32 %v1903_v22, %v505_v43  ;;  %v463_v46 = vpop.f32.mrf.mxu0 }
  0xf1   : > { %v464_v48 = vadd.f32 %v1903_v22, %v463_v46 }
  0xf2   : > { %v585_v49 = vpop.f32.mrf.mxu1  ;;  %v1985_v50 = vadd.f32 %v618_v16, %v506_v45  ;;  %v1611_v45 = vpop.eup %1610 }
  0xf3   : > { %v1987_v51 = vadd.f32 %v576_v10, %v464_v48  ;;  %vm747_vm3 = vweird.f32 %v1611_v45 }
  0xf4   : > { %v715_v52 = vsel %vm645_vm2, %v1985_v50, 0.0 }
  0xf5   : > { %v673_v53 = vsel %vm645_vm2, %v1987_v51, 0.0 }
  0xf6   : > { %716 = vadd.xlane.f32.xlu2 %v715_v52  ;;  %674 = vadd.xlane.f32.xlu0 %v673_v53 }
  0xf7   : > { %v508_v54 = vpop.f32.mrf.mxu2  ;;  %v627_v57 = vpop.f32.mrf.mxu3 }
  0xf8   : > { %v509_v58 = vadd.f32 %v1903_v22, %v508_v54  ;;  %v466_v59 = vpop.f32.mrf.mxu0 }
  0xf9   : > { %v467_v60 = vadd.f32 %v1903_v22, %v466_v59 }
  0xfa   : > { %v588_v61 = vpop.f32.mrf.mxu1  ;;  %v1995_v62 = vadd.f32 %v621_v30, %v509_v58 }
  0xfb   : > { %v1997_v63 = vadd.f32 %v579_v20, %v467_v60  ;;  %v482_v20 = vadd.f32 %v1903_v22, %v1910_v28  ;;  %v485_v28 = vadd.f32 %v1903_v22, %v1919_v35  ;;  %v743_v35 = vmul.f32 96.0, %v1611_v45 }
  0xfc   : > { %v718_v3 = vsel %vm645_vm2, %v1995_v62, 0.0 }
  0xfd   : > { %v676_v0 = vsel %vm645_vm2, %v1997_v63, 0.0 }
  0xfe   : > { %677 = vadd.xlane.f32.xlu1 %v676_v0  ;;  %719 = vadd.xlane.f32.xlu0 %v718_v3  ;;  %v744_v3 = vsub.f32 1.0, %v743_v35 }
  0xff   : > { %v511_v4 = vpop.f32.mrf.mxu2  ;;  %v630_v5 = vpop.f32.mrf.mxu3 }
 0x100   : > { %v512_v6 = vadd.f32 %v1903_v22, %v511_v4  ;;  %v469_v7 = vpop.f32.mrf.mxu0 }
 0x101   : > { %v470_v8 = vadd.f32 %v1903_v22, %v469_v7 }
 0x102   : > { %v591_v9 = vpop.f32.mrf.mxu1  ;;  %v2005_v10 = vadd.f32 %v624_v44, %v512_v6 }
 0x103   : > { %v2007_v13 = vadd.f32 %v582_v36, %v470_v8 }
 0x104   : > { %v721_v15 = vsel %vm645_vm2, %v2005_v10, 0.0 }
 0x105   : > { %v679_v14 = vsel %vm645_vm2, %v2007_v13, 0.0 }
 0x106   : > { %680 = vadd.xlane.f32.xlu2 %v679_v14  ;;  %722 = vadd.xlane.f32.xlu1 %v721_v15 }
 0x107   : > { %v514_v16 = vpop.f32.mrf.mxu2  ;;  %v633_v18 = vpop.f32.mrf.mxu3 }
 0x108   : > { %v515_v17 = vadd.f32 %v1903_v22, %v514_v16  ;;  %v472_v19 = vpop.f32.mrf.mxu0 }
 0x109   : > { %v473_v30 = vadd.f32 %v1903_v22, %v472_v19 }
 0x10a   : > { %v594_v24 = vpop.f32.mrf.mxu1  ;;  %v2016_v25 = vadd.f32 %v627_v57, %v515_v17  ;;  %v488_v57 = vadd.f32 %v1903_v22, %v1926_v42 }
 0x10b   : > { %v2018_v27 = vadd.f32 %v594_v24, %v482_v20  ;;  %v2027_v41 = vadd.f32 %v585_v49, %v473_v30 }
 0x10c   : > { %v724_v32 = vsel %vm645_vm2, %v2016_v25, 0.0 }
 0x10d   : > { %v691_v31 = vsel %vm645_vm2, %v2018_v27, 0.0  ;;  %v682_v53 = vsel %vm645_vm2, %v2027_v41, 0.0 }
 0x10e   : > { %692 = vadd.xlane.f32.xlu0 %v691_v31  ;;  %725 = vadd.xlane.f32.xlu2 %v724_v32 }
 0x10f   : > { %v517_v36 = vpop.f32.mrf.mxu2  ;;  %v636_v43 = vpop.f32.mrf.mxu3 }
 0x110   : > { %v475_v39 = vpop.f32.mrf.mxu0  ;;  %v518_v54 = vadd.f32 %v1903_v22, %v517_v36 }
 0x111   : > { %v476_v48 = vadd.f32 %v1903_v22, %v475_v39 }
 0x112   : > { %v597_v44 = vpop.f32.mrf.mxu1  ;;  %v2041_v0 = vadd.f32 %v630_v5, %v518_v54  ;;  %v745_v5 = vmul.f32 %v1611_v45, %v744_v3 }
 0x113   : > { %v2029_v46 = vadd.f32 %v597_v44, %v485_v28  ;;  %v2039_v58 = vadd.f32 %v588_v61, %v476_v48 }
 0x114   : > { %v727_v61 = vsel %vm645_vm2, %v2041_v0, 0.0  ;;  %v746_v20 = vadd.f32 %v1611_v45, %v745_v5 }
 0x115   : > { %v694_v52 = vsel %vm645_vm2, %v2029_v46, 0.0  ;;  %v685_v42 = vsel %vm645_vm2, %v2039_v58, 0.0 }
 0x116   : > { %695 = vadd.xlane.f32.xlu1 %v694_v52  ;;  %683 = vadd.xlane.f32.xlu0 %v682_v53  ;;  %v2062_v34 = vsel %vm747_vm3, %v1611_v45, %v746_v20 }
 0x117   : > { %v520_v49 = vpop.f32.mrf.mxu2  ;;  %v639_v6 = vpop.f32.mrf.mxu3 }
 0x118   : > { %v478_v59 = vpop.f32.mrf.mxu0  ;;  %v521_v7 = vadd.f32 %v1903_v22, %v520_v49 }
 0x119   : > { %v479_v8 = vadd.f32 %v1903_v22, %v478_v59 }
 0x11a   : > { %v600_v60 = vpop.f32.mrf.mxu1  ;;  %v2055_v19 = vadd.f32 %v633_v18, %v521_v7 }
 0x11b   : > { %v2043_v4 = vadd.f32 %v600_v60, %v488_v57  ;;  %v2053_v17 = vadd.f32 %v591_v9, %v479_v8  ;;  %v530_v9 = vadd.f32 %v1903_v22, %v1912_v29 }
 0x11c   : > { %v730_v31 = vsel %vm645_vm2, %v2055_v19, 0.0 }
 0x11d   : > { %v697_v14 = vsel %vm645_vm2, %v2043_v4, 0.0  ;;  %v688_v30 = vsel %vm645_vm2, %v2053_v17, 0.0 }
 0x11e   : > { %698 = vadd.xlane.f32.xlu2 %v697_v14  ;;  %686 = vadd.xlane.f32.xlu1 %v685_v42 }
 0x11f   : > { %728 = vadd.xlane.f32.xlu0 %v727_v61  ;;  %v523_v15 = vpop.f32.mrf.mxu2  ;;  %v642_v32 = vpop.f32.mrf.mxu3 }
 0x120   : > { %v524_v24 = vadd.f32 %v1903_v22, %v523_v15  ;;  %v2067_v39 = vadd.f32 %v642_v32, %v530_v9 }
 0x121   : > { %v648_v16 = vpop.xlane.xlu0 %647 }
 0x122   : > { %v749_v28 = vmul.f32 %v2062_v34, %v648_v16  ;;  %v2070_v48 = vadd.f32 %v636_v43, %v524_v24  ;;  %v739_v43 = vsel %vm645_vm2, %v2067_v39, 0.0 }
 0x124   : > { %v2081_v54 = vsub.f32 %v1906_v26, %v749_v28 }
 0x126   : > { %689 = vadd.xlane.f32.xlu2 %v688_v30  ;;  %731 = vadd.xlane.f32.xlu1 %v730_v31  ;;  %v813_v49 = vmul.f32 %v2081_v54, %v2081_v54 }
 0x127   : > { %v526_v18 = vpop.f32.mrf.mxu2 }
 0x128   : > { %v527_v36 = vadd.f32 %v1903_v22, %v526_v18  ;;  %v733_v22 = vsel %vm645_vm2, %v2070_v48, 0.0  ;;  %v845_v60 = vsel %vm645_vm2, %v813_v49, 0.0 }
 0x129   : > { %v651_v44 = vpop.xlane.xlu0 %650 }
 0x12a   : > { %v750_v52 = vmul.f32 %v2062_v34, %v651_v44  ;;  %v2073_v53 = vadd.f32 %v639_v6, %v527_v36 }
 0x12c   : > { %v2076_v45 = vsub.f32 %v1915_v33, %v750_v52  ;;  %v736_v29 = vsel %vm645_vm2, %v2073_v53, 0.0 }
 0x12d   : > { %737 = vadd.xlane.f32.xlu0 %v736_v29 }
 0x12e   : > { %734 = vadd.xlane.f32.xlu2 %v733_v22  ;;  %740 = vadd.xlane.f32.xlu1 %v739_v43  ;;  %v814_v35 = vmul.f32 %v2076_v45, %v2076_v45 }
 0x130   : > { %v848_v59 = vsel %vm645_vm2, %v814_v35, 0.0 }
 0x131   : > { %v654_v33 = vpop.xlane.xlu1 %653 }
 0x132   : > { %v751_v57 = vmul.f32 %v2062_v34, %v654_v33 }
 0x134   : > { %v2093_v26 = vsub.f32 %v1922_v40, %v751_v57 }
 0x135   : > { %849 = vadd.xlane.f32.xlu0 %v848_v59 }
 0x136   : > { %846 = vadd.xlane.f32.xlu2 %v845_v60  ;;  %v815_v3 = vmul.f32 %v2093_v26, %v2093_v26 }
 0x138   : > { %v851_v6 = vsel %vm645_vm2, %v815_v3, 0.0 }
 0x139   : > { %852 = vadd.xlane.f32.xlu1 %v851_v6  ;;  %v657_v7 = vpop.xlane.xlu1 %656 }
 0x13a   : > { %v752_v8 = vmul.f32 %v2062_v34, %v657_v7 }
 0x13c   : > { %v2102_v14 = vsub.f32 %v1929_v47, %v752_v8 }
 0x13e   : > { %v816_v40 = vmul.f32 %v2102_v14, %v2102_v14 }
 0x140   : > { %v702_v42 = vpop.xlane.xlu0 %701  ;;  %v854_v61 = vsel %vm645_vm2, %v816_v40, 0.0 }
 0x141   : > { %v767_v5 = vmul.f32 %v2062_v34, %v702_v42  ;;  %v660_v15 = vpop.xlane.xlu2 %659  ;;  %855 = vadd.xlane.f32.xlu2 %v854_v61 }
 0x142   : > { %v753_v16 = vmul.f32 %v2062_v34, %v660_v15 }
 0x143   : > { %v2110_v20 = vsub.f32 %v1935_v55, %v767_v5 }
 0x144   : > { %v2113_v24 = vsub.f32 %v1937_v56, %v753_v16 }
 0x145   : > { %v831_v47 = vmul.f32 %v2110_v20, %v2110_v20 }
 0x146   : > { %v817_v30 = vmul.f32 %v2113_v24, %v2113_v24 }
 0x147   : > { %v899_v9 = vsel %vm645_vm2, %v831_v47, 0.0 }
 0x148   : > { %v705_v31 = vpop.xlane.xlu1 %704  ;;  %v857_v32 = vsel %vm645_vm2, %v817_v30, 0.0 }
 0x149   : > { %v768_v18 = vmul.f32 %v2062_v34, %v705_v31  ;;  %v663_v36 = vpop.xlane.xlu2 %662  ;;  %858 = vadd.xlane.f32.xlu0 %v857_v32  ;;  %900 = vadd.xlane.f32.xlu2 %v899_v9 }
 0x14a   : > { %v754_v55 = vmul.f32 %v2062_v34, %v663_v36 }
 0x14b   : > { %v2124_v56 = vsub.f32 %v1945_v1, %v768_v18 }
 0x14c   : > { %v2127_v28 = vsub.f32 %v1947_v2, %v754_v55 }
 0x14d   : > { %v832_v44 = vmul.f32 %v2124_v56, %v2124_v56 }
 0x14e   : > { %v818_v52 = vmul.f32 %v2127_v28, %v2127_v28 }
 0x14f   : > { %v902_v22 = vsel %vm645_vm2, %v832_v44, 0.0 }
 0x150   : > { %v860_v29 = vsel %vm645_vm2, %v818_v52, 0.0 }
 0x151   : > { %v708_v43 = vpop.xlane.xlu2 %707  ;;  %861 = vadd.xlane.f32.xlu1 %v860_v29  ;;  %903 = vadd.xlane.f32.xlu0 %v902_v22  ;;  %v666_v35 = vpop.xlane.xlu0 %665 }
 0x152   : > { %v769_v1 = vmul.f32 %v2062_v34, %v708_v43  ;;  %v755_v33 = vmul.f32 %v2062_v34, %v666_v35 }
 0x154   : > { %v2138_v2 = vsub.f32 %v1955_v11, %v769_v1  ;;  %v2141_v49 = vsub.f32 %v1957_v12, %v755_v33 }
 0x156   : > { %v833_v57 = vmul.f32 %v2138_v2, %v2138_v2  ;;  %v819_v59 = vmul.f32 %v2141_v49, %v2141_v49 }
 0x158   : > { %v905_v60 = vsel %vm645_vm2, %v833_v57, 0.0  ;;  %v863_v3 = vsel %vm645_vm2, %v819_v59, 0.0 }
 0x159   : > { %906 = vadd.xlane.f32.xlu1 %v905_v60  ;;  %v669_v6 = vpop.xlane.xlu1 %668  ;;  %864 = vadd.xlane.f32.xlu2 %v863_v3  ;;  %v711_v7 = vpop.xlane.xlu0 %710 }
 0x15a   : > { %v756_v11 = vmul.f32 %v2062_v34, %v669_v6  ;;  %v770_v8 = vmul.f32 %v2062_v34, %v711_v7 }
 0x15c   : > { %v2152_v12 = vsub.f32 %v1967_v23, %v756_v11  ;;  %v2155_v40 = vsub.f32 %v1965_v21, %v770_v8 }
 0x15e   : > { %v820_v42 = vmul.f32 %v2152_v12, %v2152_v12  ;;  %v834_v61 = vmul.f32 %v2155_v40, %v2155_v40 }
 0x160   : > { %v866_v5 = vsel %vm645_vm2, %v820_v42, 0.0  ;;  %v908_v15 = vsel %vm645_vm2, %v834_v61, 0.0 }
 0x161   : > { %v672_v16 = vpop.xlane.xlu2 %671  ;;  %v714_v47 = vpop.xlane.xlu1 %713  ;;  %867 = vadd.xlane.f32.xlu0 %v866_v5  ;;  %909 = vadd.xlane.f32.xlu2 %v908_v15 }
 0x162   : > { %v757_v23 = vmul.f32 %v2062_v34, %v672_v16  ;;  %v771_v30 = vmul.f32 %v2062_v34, %v714_v47 }
 0x164   : > { %v2166_v21 = vsub.f32 %v1977_v38, %v757_v23  ;;  %v2169_v31 = vsub.f32 %v1975_v37, %v771_v30 }
 0x166   : > { %v821_v32 = vmul.f32 %v2166_v21, %v2166_v21  ;;  %v835_v9 = vmul.f32 %v2169_v31, %v2169_v31 }
 0x168   : > { %v869_v18 = vsel %vm645_vm2, %v821_v32, 0.0  ;;  %v911_v36 = vsel %vm645_vm2, %v835_v9, 0.0 }
 0x169   : > { %v717_v55 = vpop.xlane.xlu2 %716  ;;  %870 = vadd.xlane.f32.xlu1 %v869_v18  ;;  %912 = vadd.xlane.f32.xlu0 %v911_v36  ;;  %v675_v44 = vpop.xlane.xlu0 %674 }
 0x16a   : > { %v772_v38 = vmul.f32 %v2062_v34, %v717_v55  ;;  %v758_v52 = vmul.f32 %v2062_v34, %v675_v44 }
 0x16c   : > { %v2180_v37 = vsub.f32 %v1985_v50, %v772_v38  ;;  %v2183_v29 = vsub.f32 %v1987_v51, %v758_v52 }
 0x16e   : > { %v836_v22 = vmul.f32 %v2180_v37, %v2180_v37  ;;  %v822_v43 = vmul.f32 %v2183_v29, %v2183_v29 }
 0x170   : > { %v914_v35 = vsel %vm645_vm2, %v836_v22, 0.0  ;;  %v872_v1 = vsel %vm645_vm2, %v822_v43, 0.0 }
 0x171   : > { %915 = vadd.xlane.f32.xlu1 %v914_v35  ;;  %v678_v33 = vpop.xlane.xlu1 %677  ;;  %873 = vadd.xlane.f32.xlu2 %v872_v1  ;;  %v720_v57 = vpop.xlane.xlu0 %719 }
 0x172   : > { %v759_v50 = vmul.f32 %v2062_v34, %v678_v33  ;;  %v773_v59 = vmul.f32 %v2062_v34, %v720_v57 }
 0x174   : > { %v2194_v51 = vsub.f32 %v1997_v63, %v759_v50  ;;  %v2197_v60 = vsub.f32 %v1995_v62, %v773_v59 }
 0x176   : > { %v823_v3 = vmul.f32 %v2194_v51, %v2194_v51  ;;  %v837_v6 = vmul.f32 %v2197_v60, %v2197_v60 }
 0x178   : > { %v875_v7 = vsel %vm645_vm2, %v823_v3, 0.0  ;;  %v917_v11 = vsel %vm645_vm2, %v837_v6, 0.0 }
 0x179   : > { %v681_v8 = vpop.xlane.xlu2 %680  ;;  %v723_v42 = vpop.xlane.xlu1 %722  ;;  %876 = vadd.xlane.f32.xlu0 %v875_v7  ;;  %918 = vadd.xlane.f32.xlu2 %v917_v11 }
 0x17a   : > { %v760_v63 = vmul.f32 %v2062_v34, %v681_v8  ;;  %v774_v61 = vmul.f32 %v2062_v34, %v723_v42 }
 0x17c   : > { %v2208_v62 = vsub.f32 %v2007_v13, %v760_v63  ;;  %v2211_v5 = vsub.f32 %v2005_v10, %v774_v61 }
 0x17e   : > { %v824_v15 = vmul.f32 %v2208_v62, %v2208_v62  ;;  %v838_v16 = vmul.f32 %v2211_v5, %v2211_v5 }
 0x180   : > { %v878_v47 = vsel %vm645_vm2, %v824_v15, 0.0  ;;  %v920_v23 = vsel %vm645_vm2, %v838_v16, 0.0 }
 0x181   : > { %v693_v30 = vpop.xlane.xlu0 %692  ;;  %v726_v32 = vpop.xlane.xlu2 %725  ;;  %879 = vadd.xlane.f32.xlu1 %v878_v47  ;;  %921 = vadd.xlane.f32.xlu0 %v920_v23 }
 0x182   : > { %v764_v13 = vmul.f32 %v2062_v34, %v693_v30  ;;  %v775_v9 = vmul.f32 %v2062_v34, %v726_v32 }
 0x184   : > { %v2222_v10 = vsub.f32 %v2018_v27, %v764_v13  ;;  %v2225_v18 = vsub.f32 %v2016_v25, %v775_v9 }
 0x186   : > { %v828_v36 = vmul.f32 %v2222_v10, %v2222_v10  ;;  %v839_v55 = vmul.f32 %v2225_v18, %v2225_v18 }
 0x188   : > { %v890_v44 = vsel %vm645_vm2, %v828_v36, 0.0  ;;  %v923_v38 = vsel %vm645_vm2, %v839_v55, 0.0 }
 0x189   : > { %v696_v52 = vpop.xlane.xlu1 %695  ;;  %891 = vadd.xlane.f32.xlu2 %v890_v44  ;;  %v684_v22 = vpop.xlane.xlu0 %683  ;;  %924 = vadd.xlane.f32.xlu1 %v923_v38 }
 0x18a   : > { %v765_v27 = vmul.f32 %v2062_v34, %v696_v52  ;;  %v761_v43 = vmul.f32 %v2062_v34, %v684_v22 }
 0x18c   : > { %v2236_v25 = vsub.f32 %v2029_v46, %v765_v27  ;;  %v2239_v35 = vsub.f32 %v2027_v41, %v761_v43 }
 0x18e   : > { %v829_v1 = vmul.f32 %v2236_v25, %v2236_v25  ;;  %v825_v33 = vmul.f32 %v2239_v35, %v2239_v35 }
 0x190   : > { %v893_v57 = vsel %vm645_vm2, %v829_v1, 0.0  ;;  %v881_v50 = vsel %vm645_vm2, %v825_v33, 0.0 }
 0x191   : > { %v699_v59 = vpop.xlane.xlu2 %698  ;;  %v687_v3 = vpop.xlane.xlu1 %686  ;;  %894 = vadd.xlane.f32.xlu0 %v893_v57  ;;  %882 = vadd.xlane.f32.xlu2 %v881_v50 }
 0x192   : > { %v766_v46 = vmul.f32 %v2062_v34, %v699_v59  ;;  %v762_v6 = vmul.f32 %v2062_v34, %v687_v3  ;;  %v729_v41 = vpop.xlane.xlu0 %728 }
 0x193   : > { %v776_v7 = vmul.f32 %v2062_v34, %v729_v41 }
 0x194   : > { %v2251_v11 = vsub.f32 %v2043_v4, %v766_v46  ;;  %v2254_v8 = vsub.f32 %v2039_v58, %v762_v6 }
 0x195   : > { %v2257_v42 = vsub.f32 %v2041_v0, %v776_v7 }
 0x196   : > { %v830_v63 = vmul.f32 %v2251_v11, %v2251_v11  ;;  %v826_v61 = vmul.f32 %v2254_v8, %v2254_v8 }
 0x197   : > { %v840_v15 = vmul.f32 %v2257_v42, %v2257_v42 }
 0x198   : > { %v896_v16 = vsel %vm645_vm2, %v830_v63, 0.0  ;;  %v884_v4 = vsel %vm645_vm2, %v826_v61, 0.0 }
 0x199   : > { %v690_v47 = vpop.xlane.xlu2 %689  ;;  %897 = vadd.xlane.f32.xlu1 %v896_v16  ;;  %v732_v58 = vpop.xlane.xlu1 %731  ;;  %885 = vadd.xlane.f32.xlu0 %v884_v4  ;;  %v926_v0 = vsel %vm645_vm2, %v840_v15, 0.0 }
 0x19a   : > { %v763_v23 = vmul.f32 %v2062_v34, %v690_v47  ;;  %v777_v30 = vmul.f32 %v2062_v34, %v732_v58  ;;  %927 = vadd.xlane.f32.xlu2 %v926_v0 }
 0x19c   : > { %v2271_v32 = vsub.f32 %v2053_v17, %v763_v23  ;;  %v2274_v13 = vsub.f32 %v2055_v19, %v777_v30 }
 0x19e   : > { %v827_v9 = vmul.f32 %v2271_v32, %v2271_v32  ;;  %v841_v36 = vmul.f32 %v2274_v13, %v2274_v13 }
 0x1a0   : > { %v887_v55 = vsel %vm645_vm2, %v827_v9, 0.0  ;;  %v929_v44 = vsel %vm645_vm2, %v841_v36, 0.0  ;;  %v738_v38 = vpop.xlane.xlu0 %737 }
 0x1a1   : > { %v735_v52 = vpop.xlane.xlu2 %734  ;;  %888 = vadd.xlane.f32.xlu1 %v887_v55  ;;  %v741_v22 = vpop.xlane.xlu1 %740  ;;  %930 = vadd.xlane.f32.xlu0 %v929_v44  ;;  %v779_v17 = vmul.f32 %v2062_v34, %v738_v38 }
 0x1a2   : > { %v778_v19 = vmul.f32 %v2062_v34, %v735_v52  ;;  %v780_v27 = vmul.f32 %v2062_v34, %v741_v22 }
 0x1a3   : > { %v2286_v43 = vsub.f32 %v2073_v53, %v779_v17 }
 0x1a4   : > { %v2289_v1 = vsub.f32 %v2070_v48, %v778_v19  ;;  %v2292_v33 = vsub.f32 %v2067_v39, %v780_v27 }
 0x1a5   : > { %v843_v57 = vmul.f32 %v2286_v43, %v2286_v43 }
 0x1a6   : > { %v842_v50 = vmul.f32 %v2289_v1, %v2289_v1  ;;  %v844_v59 = vmul.f32 %v2292_v33, %v2292_v33 }
 0x1a7   : > { %v935_v3 = vsel %vm645_vm2, %v843_v57, 0.0 }
 0x1a8   : > { %v932_v53 = vsel %vm645_vm2, %v842_v50, 0.0  ;;  %v938_v46 = vsel %vm645_vm2, %v844_v59, 0.0  ;;  %936 = vadd.xlane.f32.xlu2 %v935_v3  ;;  %v850_v48 = vpop.xlane.xlu0 %849 }
 0x1a9   : > { %933 = vadd.xlane.f32.xlu1 %v932_v53  ;;  %v847_v39 = vpop.xlane.xlu2 %846  ;;  %939 = vadd.xlane.f32.xlu0 %v938_v46  ;;  %v942_v6 = vmul.f32 %v850_v48, %v2062_v34  ;;  %v2313_v53 = vld [vmem:[%s2695_s3] ss:$0 sm:$0xff] }
 0x1aa   : > { %v941_v41 = vmul.f32 %v847_v39, %v2062_v34 }
 0x1ab   : > { %v974_v7 = vadd.f32 1e-05, %v942_v6 }
 0x1ac   : > { %v973_v63 = vadd.f32 1e-05, %v941_v41  ;;  %v853_v61 = vpop.xlane.xlu1 %852 }
 0x1ad   : > { %1612 = vrsqrt.f32 %v974_v7  ;;  %v943_v15 = vmul.f32 %v853_v61, %v2062_v34  ;;  %vm1021_vm6 = vweird.f32 %v974_v7  ;;  %v2321_v61 = vld [vmem:[%s2696_s4] ss:$0 sm:$0xff] }
 0x1ae   : > { %1614 = vrsqrt.f32 %v973_v63  ;;  %vm1011_vm7 = vweird.f32 %v973_v63 }
 0x1af   : > { %v975_v16 = vadd.f32 1e-05, %v943_v15 }
 0x1b1   : > { %1616 = vrsqrt.f32 %v975_v16  ;;  %vm1031_vm11 = vweird.f32 %v975_v16 }
 0x1b3   : > { %v1613_v4 = vpop.eup %1612 }
 0x1b4   : > { %v1615_v47 = vpop.eup %1614  ;;  %v1016_v58 = vmul.f32 %v1613_v4, %v974_v7  ;;  %v856_v0 = vpop.xlane.xlu2 %855  ;;  %vm1022_vm4 = vweird.f32 %v1613_v4 }
 0x1b5   : > { %v1006_v23 = vmul.f32 %v1615_v47, %v973_v63  ;;  %v944_v30 = vmul.f32 %v856_v0, %v2062_v34  ;;  %vm1012_vm5 = vweird.f32 %v1615_v47  ;;  %vm1023_vm8 = vmor %vm1021_vm6, %vm1022_vm4 }
 0x1b6   : > { %v1017_v9 = vmul.f32 %v1613_v4, %v1016_v58  ;;  %vm1013_vm9 = vmor %vm1011_vm7, %vm1012_vm5 }
 0x1b7   : > { %v1617_v36 = vpop.eup %1616  ;;  %v1007_v55 = vmul.f32 %v1615_v47, %v1006_v23  ;;  %v2307_v44 = vadd.f32 1e-05, %v944_v30 }
 0x1b8   : > { %v1018_v38 = vmul.f32 0.5, %v1017_v9  ;;  %v1026_v52 = vmul.f32 %v1617_v36, %v975_v16  ;;  %vm1032_vm10 = vweird.f32 %v1617_v36 }
 0x1b9   : > { %v1008_v22 = vmul.f32 0.5, %v1007_v55  ;;  %1618 = vrsqrt.f32 %v2307_v44  ;;  %vm1033_vm12 = vmor %vm1031_vm11, %vm1032_vm10  ;;  %vm1041_vm14 = vweird.f32 %v2307_v44 }
 0x1ba   : > { %v1019_v17 = vsub.f32 1.5, %v1018_v38  ;;  %v1027_v19 = vmul.f32 %v1617_v36, %v1026_v52 }
 0x1bb   : > { %v1009_v27 = vsub.f32 1.5, %v1008_v22 }
 0x1bc   : > { %v1020_v57 = vmul.f32 %v1613_v4, %v1019_v17  ;;  %v1028_v50 = vmul.f32 0.5, %v1027_v19  ;;  %v901_v59 = vpop.xlane.xlu2 %900  ;;  %v859_v3 = vpop.xlane.xlu0 %858 }
 0x1bd   : > { %v1010_v46 = vmul.f32 %v1615_v47, %v1009_v27  ;;  %v959_v48 = vmul.f32 %v901_v59, %v2062_v34  ;;  %v945_v39 = vmul.f32 %v859_v3, %v2062_v34 }
 0x1be   : > { %v1024_v6 = vsel %vm1023_vm8, %v1613_v4, %v1020_v57  ;;  %v1029_v41 = vsub.f32 1.5, %v1028_v50 }
 0x1bf   : > { %v1619_v7 = vpop.eup %1618  ;;  %v1014_v15 = vsel %vm1013_vm9, %v1615_v47, %v1010_v46  ;;  %v1326_v58 = vmul.f32 %v1024_v6, %v2076_v45  ;;  %v2324_v63 = vadd.f32 1e-05, %v959_v48  ;;  %v2326_v0 = vadd.f32 1e-05, %v945_v39 }
 0x1c0   : > { %v1325_v23 = vmul.f32 %v1014_v15, %v2081_v54  ;;  %v1030_v30 = vmul.f32 %v1617_v36, %v1029_v41  ;;  %v1036_v4 = vmul.f32 %v1619_v7, %v2307_v44  ;;  %vm1042_vm13 = vweird.f32 %v1619_v7 }
 0x1c1   : > { %v1362_v9 = vmul.f32 %v2313_v53, %v1326_v58  ;;  %1620 = vrsqrt.f32 %v2324_v63  ;;  %vm1043_vm15 = vmor %vm1041_vm14, %vm1042_vm13  ;;  %vm1191_vm3 = vweird.f32 %v2324_v63  ;;  %vm1051_vm5 = vweird.f32 %v2326_v0 }
 0x1c2   : > { %v1361_v45 = vmul.f32 %v2313_v53, %v1325_v23  ;;  %v1034_v47 = vsel %vm1033_vm12, %v1617_v36, %v1030_v30  ;;  %v1037_v54 = vmul.f32 %v1619_v7, %v1036_v4  ;;  %1622 = vrsqrt.f32 %v2326_v0 }
 0x1c3   : > { %v1398_v16 = vadd.f32 %v2321_v61, %v1362_v9  ;;  %v1327_v55 = vmul.f32 %v1034_v47, %v2093_v26 }
 0x1c4   : > { %v1397_v38 = vadd.f32 %v2321_v61, %v1361_v45  ;;  %v1038_v52 = vmul.f32 0.5, %v1037_v54  ;;  %v862_v22 = vpop.xlane.xlu1 %861  ;;  %v904_v17 = vpop.xlane.xlu0 %903 }
 0x1c5   : > { %1430 = vst.msk [vmem:[%s2335_s24 + $0x8] sm:$0xff] %vm645_vm2, %v1398_v16  ;;  %v1363_v19 = vmul.f32 %v2313_v53, %v1327_v55  ;;  %v946_v27 = vmul.f32 %v862_v22, %v2062_v34  ;;  %v960_v36 = vmul.f32 %v904_v17, %v2062_v34 }
 0x1c6   : > { %1429 = vst.msk [vmem:[%s2335_s24] sm:$0xff] %vm645_vm2, %v1397_v38  ;;  %v1039_v57 = vsub.f32 1.5, %v1038_v52 }
 0x1c7   : > { %v1621_v50 = vpop.eup %1620  ;;  %v1399_v26 = vadd.f32 %v2321_v61, %v1363_v19  ;;  %v2350_v59 = vadd.f32 1e-05, %v946_v27  ;;  %v2352_v3 = vadd.f32 1e-05, %v960_v36 }
 0x1c8   : > { %v1623_v46 = vpop.eup %1622  ;;  %v1040_v48 = vmul.f32 %v1619_v7, %v1039_v57  ;;  %v1186_v39 = vmul.f32 %v1621_v50, %v2324_v63  ;;  %vm1192_vm0 = vweird.f32 %v1621_v50 }
 0x1c9   : > { %1431 = vst.msk [vmem:[%s2335_s24 + $0x10] sm:$0xff] %vm645_vm2, %v1399_v26  ;;  %v1046_v6 = vmul.f32 %v1623_v46, %v2326_v0  ;;  %1624 = vrsqrt.f32 %v2350_v59  ;;  %vm1052_vm1 = vweird.f32 %v1623_v46  ;;  %vm1193_vm4 = vmor %vm1191_vm3, %vm1192_vm0  ;;  %vm1061_vm9 = vweird.f32 %v2350_v59 }
 0x1ca   : > { %v1044_v41 = vsel %vm1043_vm15, %v1619_v7, %v1040_v48  ;;  %v1187_v15 = vmul.f32 %v1621_v50, %v1186_v39  ;;  %1626 = vrsqrt.f32 %v2352_v3  ;;  %vm1053_vm6 = vmor %vm1051_vm5, %vm1052_vm1  ;;  %vm1201_vm11 = vweird.f32 %v2352_v3 }
 0x1cb   : > { %v1328_v58 = vmul.f32 %v1044_v41, %v2102_v14  ;;  %v1047_v23 = vmul.f32 %v1623_v46, %v1046_v6 }
 0x1cc   : > { %v1188_v30 = vmul.f32 0.5, %v1187_v15  ;;  %v907_v4 = vpop.xlane.xlu1 %906  ;;  %v865_v9 = vpop.xlane.xlu2 %864 }
 0x1cd   : > { %v1364_v44 = vmul.f32 %v2313_v53, %v1328_v58  ;;  %v1048_v45 = vmul.f32 0.5, %v1047_v23  ;;  %v961_v47 = vmul.f32 %v907_v4, %v2062_v34  ;;  %v947_v54 = vmul.f32 %v865_v9, %v2062_v34 }
 0x1ce   : > { %v1189_v16 = vsub.f32 1.5, %v1188_v30 }
 0x1cf   : > { %v1625_v7 = vpop.eup %1624  ;;  %v1400_v55 = vadd.f32 %v2321_v61, %v1364_v44  ;;  %v1049_v38 = vsub.f32 1.5, %v1048_v45  ;;  %v2366_v14 = vadd.f32 1e-05, %v961_v47  ;;  %v2368_v52 = vadd.f32 1e-05, %v947_v54 }
 0x1d0   : > { %v1627_v22 = vpop.eup %1626  ;;  %v1190_v17 = vmul.f32 %v1621_v50, %v1189_v16  ;;  %v1056_v19 = vmul.f32 %v1625_v7, %v2350_v59  ;;  %vm1062_vm7 = vweird.f32 %v1625_v7 }
 0x1d1   : > { %1432 = vst.msk [vmem:[%s2335_s24 + $0x18] sm:$0xff] %vm645_vm2, %v1400_v55  ;;  %v1050_v27 = vmul.f32 %v1623_v46, %v1049_v38  ;;  %v1196_v36 = vmul.f32 %v1627_v22, %v2352_v3  ;;  %1628 = vrsqrt.f32 %v2366_v14  ;;  %vm1202_vm8 = vweird.f32 %v1627_v22  ;;  %vm1063_vm10 = vmor %vm1061_vm9, %vm1062_vm7 }
 0x1d2   : > { %v1194_v57 = vsel %vm1193_vm4, %v1621_v50, %v1190_v17  ;;  %v1057_v26 = vmul.f32 %v1625_v7, %v1056_v19  ;;  %1630 = vrsqrt.f32 %v2368_v52  ;;  %vm1203_vm12 = vmor %vm1201_vm11, %vm1202_vm8  ;;  %vm1211_vm15 = vweird.f32 %v2366_v14 }
 0x1d3   : > { %v1343_v63 = vmul.f32 %v1194_v57, %v2110_v20  ;;  %v1054_v48 = vsel %vm1053_vm6, %v1623_v46, %v1050_v27  ;;  %v1197_v39 = vmul.f32 %v1627_v22, %v1196_v36  ;;  %vm1071_vm1 = vweird.f32 %v2368_v52 }
 0x1d4   : > { %v1329_v6 = vmul.f32 %v1054_v48, %v2113_v24  ;;  %v1058_v41 = vmul.f32 0.5, %v1057_v26  ;;  %v910_v15 = vpop.xlane.xlu2 %909  ;;  %v868_v58 = vpop.xlane.xlu0 %867 }
 0x1d5   : > { %v1379_v0 = vmul.f32 %v2313_v53, %v1343_v63  ;;  %v1198_v23 = vmul.f32 0.5, %v1197_v39  ;;  %v962_v30 = vmul.f32 %v910_v15, %v2062_v34  ;;  %v948_v50 = vmul.f32 %v868_v58, %v2062_v34 }
 0x1d6   : > { %v1365_v4 = vmul.f32 %v2313_v53, %v1329_v6  ;;  %v1059_v9 = vsub.f32 1.5, %v1058_v41 }
 0x1d7   : > { %v1629_v20 = vpop.eup %1628  ;;  %v1415_v24 = vadd.f32 %v2321_v61, %v1379_v0  ;;  %v1199_v46 = vsub.f32 1.5, %v1198_v23  ;;  %v2386_v44 = vadd.f32 1e-05, %v962_v30  ;;  %v2388_v45 = vadd.f32 1e-05, %v948_v50 }
 0x1d8   : > { %v1631_v47 = vpop.eup %1630  ;;  %v1401_v54 = vadd.f32 %v2321_v61, %v1365_v4  ;;  %v1060_v16 = vmul.f32 %v1625_v7, %v1059_v9  ;;  %v1206_v55 = vmul.f32 %v1629_v20, %v2366_v14  ;;  %vm1212_vm13 = vweird.f32 %v1629_v20 }
 0x1d9   : > { %1447 = vst.msk [vmem:[%s2335_s24 + $0x90] sm:$0xff] %vm645_vm2, %v1415_v24  ;;  %v1200_v38 = vmul.f32 %v1627_v22, %v1199_v46  ;;  %v1066_v17 = vmul.f32 %v1631_v47, %v2368_v52  ;;  %1632 = vrsqrt.f32 %v2386_v44  ;;  %vm1072_vm14 = vweird.f32 %v1631_v47  ;;  %vm1213_vm0 = vmor %vm1211_vm15, %vm1212_vm13 }
 0x1da   : > { %1433 = vst.msk [vmem:[%s2335_s24 + $0x20] sm:$0xff] %vm645_vm2, %v1401_v54  ;;  %v1064_v19 = vsel %vm1063_vm10, %v1625_v7, %v1060_v16  ;;  %v1207_v27 = vmul.f32 %v1629_v20, %v1206_v55  ;;  %1634 = vrsqrt.f32 %v2388_v45  ;;  %vm1073_vm3 = vmor %vm1071_vm1, %vm1072_vm14  ;;  %vm1221_vm6 = vweird.f32 %v2386_v44 }
 0x1db   : > { %v1330_v59 = vmul.f32 %v1064_v19, %v2127_v28  ;;  %v1204_v36 = vsel %vm1203_vm12, %v1627_v22, %v1200_v38  ;;  %v1067_v57 = vmul.f32 %v1631_v47, %v1066_v17  ;;  %vm1081_vm8 = vweird.f32 %v2388_v45 }
 0x1dc   : > { %v1344_v26 = vmul.f32 %v1204_v36, %v2124_v56  ;;  %v1208_v63 = vmul.f32 0.5, %v1207_v27  ;;  %v871_v3 = vpop.xlane.xlu1 %870  ;;  %v913_v48 = vpop.xlane.xlu0 %912 }
 0x1dd   : > { %v1366_v39 = vmul.f32 %v2313_v53, %v1330_v59  ;;  %v1068_v6 = vmul.f32 0.5, %v1067_v57  ;;  %v949_v41 = vmul.f32 %v871_v3, %v2062_v34  ;;  %v963_v7 = vmul.f32 %v913_v48, %v2062_v34 }
 0x1de   : > { %v1380_v15 = vmul.f32 %v2313_v53, %v1344_v26  ;;  %v1209_v58 = vsub.f32 1.5, %v1208_v63 }
 0x1df   : > { %v1633_v28 = vpop.eup %1632  ;;  %v1402_v56 = vadd.f32 %v2321_v61, %v1366_v39  ;;  %v1069_v22 = vsub.f32 1.5, %v1068_v6  ;;  %v2409_v0 = vadd.f32 1e-05, %v949_v41  ;;  %v2411_v23 = vadd.f32 1e-05, %v963_v7 }
 0x1e0   : > { %v1635_v30 = vpop.eup %1634  ;;  %v1416_v50 = vadd.f32 %v2321_v61, %v1380_v15  ;;  %v1210_v4 = vmul.f32 %v1629_v20, %v1209_v58  ;;  %v1216_v9 = vmul.f32 %v1633_v28, %v2386_v44  ;;  %vm1222_vm4 = vweird.f32 %v1633_v28 }
 0x1e1   : > { %1434 = vst.msk [vmem:[%s2335_s24 + $0x28] sm:$0xff] %vm645_vm2, %v1402_v56  ;;  %v1070_v24 = vmul.f32 %v1631_v47, %v1069_v22  ;;  %v1076_v46 = vmul.f32 %v1635_v30, %v2388_v45  ;;  %1636 = vrsqrt.f32 %v2409_v0  ;;  %vm1082_vm5 = vweird.f32 %v1635_v30  ;;  %vm1223_vm7 = vmor %vm1221_vm6, %vm1222_vm4 }
 0x1e2   : > { %1448 = vst.msk [vmem:[%s2335_s24 + $0x98] sm:$0xff] %vm645_vm2, %v1416_v50  ;;  %v1214_v54 = vsel %vm1213_vm0, %v1629_v20, %v1210_v4  ;;  %v1217_v16 = vmul.f32 %v1633_v28, %v1216_v9  ;;  %1638 = vrsqrt.f32 %v2411_v23  ;;  %vm1083_vm9 = vmor %vm1081_vm8, %vm1082_vm5  ;;  %vm1091_vm12 = vweird.f32 %v2409_v0 }
 0x1e3   : > { %v1345_v14 = vmul.f32 %v1214_v54, %v2138_v2  ;;  %v1074_v55 = vsel %vm1073_vm3, %v1631_v47, %v1070_v24  ;;  %v1077_v38 = vmul.f32 %v1635_v30, %v1076_v46  ;;  %vm1231_vm14 = vweird.f32 %v2411_v23 }
 0x1e4   : > { %v1331_v17 = vmul.f32 %v1074_v55, %v2141_v49  ;;  %v1218_v19 = vmul.f32 0.5, %v1217_v16  ;;  %v916_v52 = vpop.xlane.xlu1 %915  ;;  %v874_v27 = vpop.xlane.xlu2 %873 }
 0x1e5   : > { %v1381_v59 = vmul.f32 %v2313_v53, %v1345_v14  ;;  %v1078_v36 = vmul.f32 0.5, %v1077_v38  ;;  %v964_v57 = vmul.f32 %v916_v52, %v2062_v34  ;;  %v950_v20 = vmul.f32 %v874_v27, %v2062_v34 }
 0x1e6   : > { %v1367_v26 = vmul.f32 %v2313_v53, %v1331_v17  ;;  %v1219_v63 = vsub.f32 1.5, %v1218_v19 }
 0x1e7   : > { %v1637_v2 = vpop.eup %1636  ;;  %v1417_v49 = vadd.f32 %v2321_v61, %v1381_v59  ;;  %v1079_v47 = vsub.f32 1.5, %v1078_v36  ;;  %v2432_v3 = vadd.f32 1e-05, %v964_v57  ;;  %v2434_v48 = vadd.f32 1e-05, %v950_v20 }
 0x1e8   : > { %v1639_v39 = vpop.eup %1638  ;;  %v1403_v6 = vadd.f32 %v2321_v61, %v1367_v26  ;;  %v1220_v41 = vmul.f32 %v1633_v28, %v1219_v63  ;;  %v1086_v7 = vmul.f32 %v1637_v2, %v2409_v0  ;;  %vm1092_vm10 = vweird.f32 %v1637_v2 }
 0x1e9   : > { %1449 = vst.msk [vmem:[%s2335_s24 + $0xa0] sm:$0xff] %vm645_vm2, %v1417_v49  ;;  %v1080_v15 = vmul.f32 %v1635_v30, %v1079_v47  ;;  %v1226_v58 = vmul.f32 %v1639_v39, %v2411_v23  ;;  %1640 = vrsqrt.f32 %v2432_v3  ;;  %vm1232_vm11 = vweird.f32 %v1639_v39  ;;  %vm1093_vm13 = vmor %vm1091_vm12, %vm1092_vm10 }
 0x1ea   : > { %1435 = vst.msk [vmem:[%s2335_s24 + $0x30] sm:$0xff] %vm645_vm2, %v1403_v6  ;;  %v1224_v56 = vsel %vm1223_vm7, %v1633_v28, %v1220_v41  ;;  %v1087_v22 = vmul.f32 %v1637_v2, %v1086_v7  ;;  %1642 = vrsqrt.f32 %v2434_v48  ;;  %vm1233_vm15 = vmor %vm1231_vm14, %vm1232_vm11  ;;  %vm1241_vm3 = vweird.f32 %v2432_v3 }
 0x1eb   : > { %v1346_v44 = vmul.f32 %v1224_v56, %v2155_v40  ;;  %v1084_v50 = vsel %vm1083_vm9, %v1635_v30, %v1080_v15  ;;  %v1227_v4 = vmul.f32 %v1639_v39, %v1226_v58  ;;  %vm1101_vm5 = vweird.f32 %v2434_v48 }
 0x1ec   : > { %v1332_v9 = vmul.f32 %v1084_v50, %v2152_v12  ;;  %v1088_v24 = vmul.f32 0.5, %v1087_v22  ;;  %v919_v45 = vpop.xlane.xlu2 %918  ;;  %v877_v46 = vpop.xlane.xlu0 %876 }
 0x1ed   : > { %v1382_v54 = vmul.f32 %v2313_v53, %v1346_v44  ;;  %v1228_v16 = vmul.f32 0.5, %v1227_v4  ;;  %v965_v14 = vmul.f32 %v919_v45, %v2062_v34  ;;  %v951_v28 = vmul.f32 %v877_v46, %v2062_v34 }
 0x1ee   : > { %v1368_v55 = vmul.f32 %v2313_v53, %v1332_v9  ;;  %v1089_v38 = vsub.f32 1.5, %v1088_v24 }
 0x1ef   : > { %v1641_v40 = vpop.eup %1640  ;;  %v1418_v12 = vadd.f32 %v2321_v61, %v1382_v54  ;;  %v1229_v30 = vsub.f32 1.5, %v1228_v16  ;;  %v2455_v17 = vadd.f32 1e-05, %v965_v14  ;;  %v2457_v19 = vadd.f32 1e-05, %v951_v28 }
 0x1f0   : > { %v1643_v52 = vpop.eup %1642  ;;  %v1404_v27 = vadd.f32 %v2321_v61, %v1368_v55  ;;  %v1090_v59 = vmul.f32 %v1637_v2, %v1089_v38  ;;  %v1236_v36 = vmul.f32 %v1641_v40, %v2432_v3  ;;  %vm1242_vm0 = vweird.f32 %v1641_v40 }
 0x1f1   : > { %1450 = vst.msk [vmem:[%s2335_s24 + $0xa8] sm:$0xff] %vm645_vm2, %v1418_v12  ;;  %v1230_v57 = vmul.f32 %v1639_v39, %v1229_v30  ;;  %v1096_v20 = vmul.f32 %v1643_v52, %v2434_v48  ;;  %1644 = vrsqrt.f32 %v2455_v17  ;;  %vm1102_vm1 = vweird.f32 %v1643_v52  ;;  %vm1243_vm4 = vmor %vm1241_vm3, %vm1242_vm0 }
 0x1f2   : > { %1436 = vst.msk [vmem:[%s2335_s24 + $0x38] sm:$0xff] %vm645_vm2, %v1404_v27  ;;  %v1094_v26 = vsel %vm1093_vm13, %v1637_v2, %v1090_v59  ;;  %v1237_v63 = vmul.f32 %v1641_v40, %v1236_v36  ;;  %1646 = vrsqrt.f32 %v2457_v19  ;;  %vm1103_vm6 = vmor %vm1101_vm5, %vm1102_vm1  ;;  %vm1251_vm9 = vweird.f32 %v2455_v17 }
 0x1f3   : > { %v1333_v0 = vmul.f32 %v1094_v26, %v2166_v21  ;;  %v1234_v49 = vsel %vm1233_vm15, %v1639_v39, %v1230_v57  ;;  %v1097_v47 = vmul.f32 %v1643_v52, %v1096_v20  ;;  %vm1111_vm11 = vweird.f32 %v2457_v19 }
 0x1f4   : > { %v1347_v6 = vmul.f32 %v1234_v49, %v2169_v31  ;;  %v1238_v41 = vmul.f32 0.5, %v1237_v63  ;;  %v880_v23 = vpop.xlane.xlu1 %879  ;;  %v922_v7 = vpop.xlane.xlu0 %921 }
 0x1f5   : > { %v1369_v15 = vmul.f32 %v2313_v53, %v1333_v0  ;;  %v1098_v58 = vmul.f32 0.5, %v1097_v47  ;;  %v952_v56 = vmul.f32 %v880_v23, %v2062_v34  ;;  %v966_v2 = vmul.f32 %v922_v7, %v2062_v34 }
 0x1f6   : > { %v1383_v22 = vmul.f32 %v2313_v53, %v1347_v6  ;;  %v1239_v44 = vsub.f32 1.5, %v1238_v41 }
 0x1f7   : > { %v1645_v21 = vpop.eup %1644  ;;  %v1405_v31 = vadd.f32 %v2321_v61, %v1369_v15  ;;  %v1099_v39 = vsub.f32 1.5, %v1098_v58  ;;  %v2478_v50 = vadd.f32 1e-05, %v952_v56  ;;  %v2480_v4 = vadd.f32 1e-05, %v966_v2 }
 0x1f8   : > { %v1647_v9 = vpop.eup %1646  ;;  %v1419_v24 = vadd.f32 %v2321_v61, %v1383_v22  ;;  %v1240_v45 = vmul.f32 %v1641_v40, %v1239_v44  ;;  %v1246_v46 = vmul.f32 %v1645_v21, %v2455_v17  ;;  %vm1252_vm7 = vweird.f32 %v1645_v21 }
 0x1f9   : > { %1437 = vst.msk [vmem:[%s2335_s24 + $0x40] sm:$0xff] %vm645_vm2, %v1405_v31  ;;  %v1100_v54 = vmul.f32 %v1643_v52, %v1099_v39  ;;  %v1106_v16 = vmul.f32 %v1647_v9, %v2457_v19  ;;  %1648 = vrsqrt.f32 %v2478_v50  ;;  %vm1112_vm8 = vweird.f32 %v1647_v9  ;;  %vm1253_vm10 = vmor %vm1251_vm9, %vm1252_vm7 }
 0x1fa   : > { %1451 = vst.msk [vmem:[%s2335_s24 + $0xb0] sm:$0xff] %vm645_vm2, %v1419_v24  ;;  %v1244_v14 = vsel %vm1243_vm4, %v1641_v40, %v1240_v45  ;;  %v1247_v28 = vmul.f32 %v1645_v21, %v1246_v46  ;;  %1650 = vrsqrt.f32 %v2480_v4  ;;  %vm1113_vm12 = vmor %vm1111_vm11, %vm1112_vm8  ;;  %vm1121_vm15 = vweird.f32 %v2478_v50 }
 0x1fb   : > { %v1348_v3 = vmul.f32 %v1244_v14, %v2180_v37  ;;  %v1104_v55 = vsel %vm1103_vm6, %v1643_v52, %v1100_v54  ;;  %v1107_v38 = vmul.f32 %v1647_v9, %v1106_v16  ;;  %vm1261_vm1 = vweird.f32 %v2480_v4 }
 0x1fc   : > { %v1334_v12 = vmul.f32 %v1104_v55, %v2183_v29  ;;  %v1248_v30 = vmul.f32 0.5, %v1247_v28  ;;  %v892_v48 = vpop.xlane.xlu2 %891  ;;  %v925_v27 = vpop.xlane.xlu1 %924 }
 0x1fd   : > { %v1384_v59 = vmul.f32 %v2313_v53, %v1348_v3  ;;  %v1108_v36 = vmul.f32 0.5, %v1107_v38  ;;  %v956_v57 = vmul.f32 %v892_v48, %v2062_v34  ;;  %v967_v40 = vmul.f32 %v925_v27, %v2062_v34 }
 0x1fe   : > { %v1370_v20 = vmul.f32 %v2313_v53, %v1334_v12  ;;  %v1249_v26 = vsub.f32 1.5, %v1248_v30 }
 0x1ff   : > { %v1649_v37 = vpop.eup %1648  ;;  %v1420_v29 = vadd.f32 %v2321_v61, %v1384_v59  ;;  %v1109_v52 = vsub.f32 1.5, %v1108_v36  ;;  %v2501_v63 = vadd.f32 1e-05, %v956_v57  ;;  %v2503_v0 = vadd.f32 1e-05, %v967_v40 }
 0x200   : > { %v1651_v49 = vpop.eup %1650  ;;  %v1406_v47 = vadd.f32 %v2321_v61, %v1370_v20  ;;  %v1250_v6 = vmul.f32 %v1645_v21, %v1249_v26  ;;  %v1116_v41 = vmul.f32 %v1649_v37, %v2478_v50  ;;  %vm1122_vm13 = vweird.f32 %v1649_v37 }
 0x201   : > { %1452 = vst.msk [vmem:[%s2335_s24 + $0xb8] sm:$0xff] %vm645_vm2, %v1420_v29  ;;  %v1110_v23 = vmul.f32 %v1647_v9, %v1109_v52  ;;  %v1256_v7 = vmul.f32 %v1651_v49, %v2480_v4  ;;  %1652 = vrsqrt.f32 %v2501_v63  ;;  %vm1262_vm14 = vweird.f32 %v1651_v49  ;;  %vm1123_vm0 = vmor %vm1121_vm15, %vm1122_vm13 }
 0x202   : > { %1438 = vst.msk [vmem:[%s2335_s24 + $0x48] sm:$0xff] %vm645_vm2, %v1406_v47  ;;  %v1254_v15 = vsel %vm1253_vm10, %v1645_v21, %v1250_v6  ;;  %v1117_v58 = vmul.f32 %v1649_v37, %v1116_v41  ;;  %1654 = vrsqrt.f32 %v2503_v0  ;;  %vm1263_vm3 = vmor %vm1261_vm1, %vm1262_vm14  ;;  %vm1161_vm6 = vweird.f32 %v2501_v63 }
 0x203   : > { %v1349_v17 = vmul.f32 %v1254_v15, %v2197_v60  ;;  %v1114_v56 = vsel %vm1113_vm12, %v1647_v9, %v1110_v23  ;;  %v1257_v2 = vmul.f32 %v1651_v49, %v1256_v7  ;;  %vm1271_vm8 = vweird.f32 %v2503_v0 }
 0x204   : > { %v1335_v22 = vmul.f32 %v1114_v56, %v2194_v51  ;;  %v1118_v44 = vmul.f32 0.5, %v1117_v58  ;;  %v883_v19 = vpop.xlane.xlu2 %882  ;;  %v895_v31 = vpop.xlane.xlu0 %894 }
 0x205   : > { %v1385_v39 = vmul.f32 %v2313_v53, %v1349_v17  ;;  %v1258_v24 = vmul.f32 0.5, %v1257_v2  ;;  %v953_v45 = vmul.f32 %v883_v19, %v2062_v34  ;;  %v957_v21 = vmul.f32 %v895_v31, %v2062_v34 }
 0x206   : > { %v1371_v46 = vmul.f32 %v2313_v53, %v1335_v22  ;;  %v1119_v54 = vsub.f32 1.5, %v1118_v44 }
 0x207   : > { %v1653_v60 = vpop.eup %1652  ;;  %v1421_v51 = vadd.f32 %v2321_v61, %v1385_v39  ;;  %v1259_v9 = vsub.f32 1.5, %v1258_v24  ;;  %v2524_v16 = vadd.f32 1e-05, %v953_v45  ;;  %v2526_v14 = vadd.f32 1e-05, %v957_v21 }
 0x208   : > { %v1655_v28 = vpop.eup %1654  ;;  %v1407_v3 = vadd.f32 %v2321_v61, %v1371_v46  ;;  %v1120_v55 = vmul.f32 %v1649_v37, %v1119_v54  ;;  %v1156_v38 = vmul.f32 %v1653_v60, %v2501_v63  ;;  %vm1162_vm4 = vweird.f32 %v1653_v60 }
 0x209   : > { %1453 = vst.msk [vmem:[%s2335_s24 + $0xc0] sm:$0xff] %vm645_vm2, %v1421_v51  ;;  %v1260_v12 = vmul.f32 %v1651_v49, %v1259_v9  ;;  %v1266_v30 = vmul.f32 %v1655_v28, %v2503_v0  ;;  %1656 = vrsqrt.f32 %v2524_v16  ;;  %vm1272_vm5 = vweird.f32 %v1655_v28  ;;  %vm1163_vm7 = vmor %vm1161_vm6, %vm1162_vm4 }
 0x20a   : > { %1439 = vst.msk [vmem:[%s2335_s24 + $0x50] sm:$0xff] %vm645_vm2, %v1407_v3  ;;  %v1124_v48 = vsel %vm1123_vm0, %v1649_v37, %v1120_v55  ;;  %v1157_v27 = vmul.f32 %v1653_v60, %v1156_v38  ;;  %1658 = vrsqrt.f32 %v2526_v14  ;;  %vm1273_vm9 = vmor %vm1271_vm8, %vm1272_vm5  ;;  %vm1131_vm12 = vweird.f32 %v2524_v16 }
 0x20b   : > { %v1336_v50 = vmul.f32 %v1124_v48, %v2208_v62  ;;  %v1264_v59 = vsel %vm1263_vm3, %v1651_v49, %v1260_v12  ;;  %v1267_v36 = vmul.f32 %v1655_v28, %v1266_v30  ;;  %vm1171_vm14 = vweird.f32 %v2526_v14 }
 0x20c   : > { %v1350_v57 = vmul.f32 %v1264_v59, %v2211_v5  ;;  %v1158_v40 = vmul.f32 0.5, %v1157_v27  ;;  %v898_v4 = vpop.xlane.xlu1 %897  ;;  %v886_v20 = vpop.xlane.xlu0 %885 }
 0x20d   : > { %v1372_v26 = vmul.f32 %v2313_v53, %v1336_v50  ;;  %v1268_v29 = vmul.f32 0.5, %v1267_v36  ;;  %v958_v37 = vmul.f32 %v898_v4, %v2062_v34  ;;  %v928_v52 = vpop.xlane.xlu2 %927  ;;  %v954_v47 = vmul.f32 %v886_v20, %v2062_v34 }
 0x20e   : > { %v1386_v6 = vmul.f32 %v2313_v53, %v1350_v57  ;;  %v1159_v62 = vsub.f32 1.5, %v1158_v40  ;;  %v968_v49 = vmul.f32 %v928_v52, %v2062_v34 }
 0x20f   : > { %v1657_v5 = vpop.eup %1656  ;;  %v1408_v41 = vadd.f32 %v2321_v61, %v1372_v26  ;;  %v1269_v23 = vsub.f32 1.5, %v1268_v29  ;;  %v2548_v7 = vadd.f32 1e-05, %v958_v37  ;;  %v2550_v15 = vadd.f32 1e-05, %v954_v47 }
 0x210   : > { %v1659_v58 = vpop.eup %1658  ;;  %v1422_v17 = vadd.f32 %v2321_v61, %v1386_v6  ;;  %v1160_v56 = vmul.f32 %v1653_v60, %v1159_v62  ;;  %v1126_v2 = vmul.f32 %v1657_v5, %v2524_v16  ;;  %v2564_v63 = vadd.f32 1e-05, %v968_v49 }
 0x211   : > { %1440 = vst.msk [vmem:[%s2335_s24 + $0x58] sm:$0xff] %vm645_vm2, %v1408_v41  ;;  %v1270_v22 = vmul.f32 %v1655_v28, %v1269_v23  ;;  %v1166_v44 = vmul.f32 %v1659_v58, %v2526_v14  ;;  %1660 = vrsqrt.f32 %v2548_v7  ;;  %vm1132_vm10 = vweird.f32 %v1657_v5 }
 0x212   : > { %1454 = vst.msk [vmem:[%s2335_s24 + $0xc8] sm:$0xff] %vm645_vm2, %v1422_v17  ;;  %v1164_v19 = vsel %vm1163_vm7, %v1653_v60, %v1160_v56  ;;  %v1127_v31 = vmul.f32 %v1657_v5, %v1126_v2  ;;  %1662 = vrsqrt.f32 %v2550_v15  ;;  %vm1172_vm11 = vweird.f32 %v1659_v58  ;;  %vm1133_vm13 = vmor %vm1131_vm12, %vm1132_vm10 }
 0x213   : > { %v1340_v39 = vmul.f32 %v1164_v19, %v2222_v10  ;;  %v1274_v24 = vsel %vm1273_vm9, %v1655_v28, %v1270_v22  ;;  %v1167_v45 = vmul.f32 %v1659_v58, %v1166_v44  ;;  %1664 = vrsqrt.f32 %v2564_v63  ;;  %vm1173_vm15 = vmor %vm1171_vm14, %vm1172_vm11 }
 0x214   : > { %v1351_v0 = vmul.f32 %v1274_v24, %v2225_v18  ;;  %v1128_v21 = vmul.f32 0.5, %v1127_v31  ;;  %v889_v46 = vpop.xlane.xlu1 %888  ;;  %v931_v54 = vpop.xlane.xlu0 %930  ;;  %vm1181_vm0 = vweird.f32 %v2548_v7  ;;  %vm1141_vm1 = vweird.f32 %v2550_v15 }
 0x215   : > { %v1376_v60 = vmul.f32 %v2313_v53, %v1340_v39  ;;  %v1168_v51 = vmul.f32 0.5, %v1167_v45  ;;  %v955_v9 = vmul.f32 %v889_v46, %v2062_v34  ;;  %v969_v28 = vmul.f32 %v931_v54, %v2062_v34 }
 0x216   : > { %v1387_v3 = vmul.f32 %v2313_v53, %v1351_v0  ;;  %v1129_v10 = vsub.f32 1.5, %v1128_v21  ;;  %vm1281_vm7 = vweird.f32 %v2564_v63 }
 0x217   : > { %v2574_v55 = vpop.eup %1660  ;;  %v1412_v18 = vadd.f32 %v2321_v61, %v1376_v60  ;;  %v1169_v38 = vsub.f32 1.5, %v1168_v51  ;;  %v2577_v12 = vadd.f32 1e-05, %v955_v9  ;;  %v2589_v36 = vadd.f32 1e-05, %v969_v28 }
 0x218   : > { %v1423_v30 = vadd.f32 %v2321_v61, %v1387_v3  ;;  %v1130_v48 = vmul.f32 %v1657_v5, %v1129_v10  ;;  %v1176_v27 = vmul.f32 %v2574_v55, %v2548_v7  ;;  %v2583_v50 = vpop.eup %1662  ;;  %vm1182_vm3 = vweird.f32 %v2574_v55 }
 0x219   : > { %1444 = vst.msk [vmem:[%s2335_s24 + $0x78] sm:$0xff] %vm645_vm2, %v1412_v18  ;;  %v1170_v59 = vmul.f32 %v1659_v58, %v1169_v38  ;;  %1666 = vrsqrt.f32 %v2577_v12  ;;  %v1665_v57 = vpop.eup %1664  ;;  %v1136_v4 = vmul.f32 %v2583_v50, %v2550_v15  ;;  %vm1142_vm4 = vweird.f32 %v2583_v50  ;;  %vm1183_vm5 = vmor %vm1181_vm0, %vm1182_vm3 }
 0x21a   : > { %1455 = vst.msk [vmem:[%s2335_s24 + $0xd0] sm:$0xff] %vm645_vm2, %v1423_v30  ;;  %v1134_v40 = vsel %vm1133_vm13, %v1657_v5, %v1130_v48  ;;  %v1177_v16 = vmul.f32 %v2574_v55, %v1176_v27  ;;  %v1276_v26 = vmul.f32 %v1665_v57, %v2564_v63  ;;  %1668 = vrsqrt.f32 %v2589_v36  ;;  %vm1143_vm8 = vmor %vm1141_vm1, %vm1142_vm4 }
 0x21b   : > { %v1337_v20 = vmul.f32 %v1134_v40, %v2239_v35  ;;  %v1174_v14 = vsel %vm1173_vm15, %v1659_v58, %v1170_v59  ;;  %v937_v29 = vpop.xlane.xlu2 %936  ;;  %v1137_v47 = vmul.f32 %v2583_v50, %v1136_v4  ;;  %vm1282_vm6 = vweird.f32 %v1665_v57 }
 0x21c   : > { %v1341_v37 = vmul.f32 %v1174_v14, %v2236_v25  ;;  %v1178_v52 = vmul.f32 0.5, %v1177_v16  ;;  %v934_v6 = vpop.xlane.xlu1 %933  ;;  %v1277_v49 = vmul.f32 %v1665_v57, %v1276_v26  ;;  %v971_v25 = vmul.f32 %v937_v29, %v2062_v34  ;;  %v940_v58 = vpop.xlane.xlu0 %939  ;;  %vm1283_vm9 = vmor %vm1281_vm7, %vm1282_vm6 }
 0x21d   : > { %v1373_v62 = vmul.f32 %v2313_v53, %v1337_v20  ;;  %v970_v35 = vmul.f32 %v934_v6, %v2062_v34  ;;  %v1138_v23 = vmul.f32 0.5, %v1137_v47  ;;  %v972_v45 = vmul.f32 %v940_v58, %v2062_v34 }
 0x21e   : > { %v1377_v5 = vmul.f32 %v2313_v53, %v1341_v37  ;;  %v1179_v41 = vsub.f32 1.5, %v1178_v52  ;;  %v1278_v2 = vmul.f32 0.5, %v1277_v49  ;;  %v2628_v60 = vadd.f32 1e-05, %v971_v25 }
 0x21f   : > { %v1667_v17 = vpop.eup %1666  ;;  %v1409_v56 = vadd.f32 %v2321_v61, %v1373_v62  ;;  %v2611_v22 = vadd.f32 1e-05, %v970_v35  ;;  %v1139_v31 = vsub.f32 1.5, %v1138_v23  ;;  %v2642_v15 = vadd.f32 1e-05, %v972_v45 }
 0x220   : > { %v1413_v44 = vadd.f32 %v2321_v61, %v1377_v5  ;;  %v1180_v19 = vmul.f32 %v2574_v55, %v1179_v41  ;;  %v1146_v39 = vmul.f32 %v1667_v17, %v2577_v12  ;;  %v1279_v24 = vsub.f32 1.5, %v1278_v2  ;;  %v1669_v0 = vpop.eup %1668  ;;  %v1676_v2 = vld [vmem:[%s2695_s3] ss:$0 sm:$0xff] }
 0x221   : > { %1441 = vst.msk [vmem:[%s2335_s24 + $0x60] sm:$0xff] %vm645_vm2, %v1409_v56  ;;  %1670 = vrsqrt.f32 %v2611_v22  ;;  %v1140_v46 = vmul.f32 %v2583_v50, %v1139_v31  ;;  %v1286_v34 = vmul.f32 %v1669_v0, %v2589_v36  ;;  %vm1152_vm10 = vweird.f32 %v1667_v17 }
 0x222   : > { %1445 = vst.msk [vmem:[%s2335_s24 + $0x80] sm:$0xff] %vm645_vm2, %v1413_v44  ;;  %v1184_v21 = vsel %vm1183_vm5, %v2574_v55, %v1180_v19  ;;  %v1147_v54 = vmul.f32 %v1667_v17, %v1146_v39  ;;  %v1280_v7 = vmul.f32 %v1665_v57, %v1279_v24  ;;  %1672 = vrsqrt.f32 %v2628_v60 }
 0x223   : > { %v1342_v51 = vmul.f32 %v1184_v21, %v2251_v11  ;;  %v1144_v9 = vsel %vm1143_vm8, %v2583_v50, %v1140_v46  ;;  %v1287_v63 = vmul.f32 %v1669_v0, %v1286_v34  ;;  %vm1151_vm11 = vweird.f32 %v2577_v12 }
 0x224   : > { %v1148_v3 = vmul.f32 0.5, %v1147_v54  ;;  %v1284_v11 = vsel %vm1283_vm9, %v1665_v57, %v1280_v7  ;;  %v1338_v28 = vmul.f32 %v1144_v9, %v2254_v8  ;;  %vm1153_vm12 = vmor %vm1151_vm11, %vm1152_vm10  ;;  %vm1292_vm13 = vweird.f32 %v1669_v0 }
 0x225   : > { %v1378_v10 = vmul.f32 %v2313_v53, %v1342_v51  ;;  %v1352_v55 = vmul.f32 %v1284_v11, %v2257_v42  ;;  %v1288_v27 = vmul.f32 0.5, %v1287_v63  ;;  %1674 = vrsqrt.f32 %v2642_v15 }
 0x226   : > { %v1149_v18 = vsub.f32 1.5, %v1148_v3  ;;  %v1374_v48 = vmul.f32 %v2313_v53, %v1338_v28  ;;  %vm1291_vm14 = vweird.f32 %v2589_v36  ;;  %vm1301_vm1 = vweird.f32 %v2611_v22 }
 0x227   : > { %v1671_v38 = vpop.eup %1670  ;;  %v1414_v30 = vadd.f32 %v2321_v61, %v1378_v10  ;;  %v1388_v50 = vmul.f32 %v2313_v53, %v1352_v55  ;;  %v1289_v57 = vsub.f32 1.5, %v1288_v27  ;;  %vm1293_vm15 = vmor %vm1291_vm14, %vm1292_vm13  ;;  %vm1311_vm5 = vweird.f32 %v2628_v60 }
 0x228   : > { %v1150_v59 = vmul.f32 %v1667_v17, %v1149_v18  ;;  %v1296_v8 = vmul.f32 %v1671_v38, %v2611_v22  ;;  %v1410_v42 = vadd.f32 %v2321_v61, %v1374_v48  ;;  %v1673_v40 = vpop.eup %1672  ;;  %vm1302_vm0 = vweird.f32 %v1671_v38 }
 0x229   : > { %1446 = vst.msk [vmem:[%s2335_s24 + $0x88] sm:$0xff] %vm645_vm2, %v1414_v30  ;;  %v1424_v16 = vadd.f32 %v2321_v61, %v1388_v50  ;;  %v1290_v14 = vmul.f32 %v1669_v0, %v1289_v57  ;;  %v1306_v26 = vmul.f32 %v1673_v40, %v2628_v60  ;;  %vm1303_vm3 = vmor %vm1301_vm1, %vm1302_vm0  ;;  %vm1312_vm4 = vweird.f32 %v1673_v40 }
 0x22a   : > { %v1154_v4 = vsel %vm1153_vm12, %v1667_v17, %v1150_v59  ;;  %v1297_v20 = vmul.f32 %v1671_v38, %v1296_v8  ;;  %1442 = vst.msk [vmem:[%s2335_s24 + $0x68] sm:$0xff] %vm645_vm2, %v1410_v42  ;;  %vm1313_vm6 = vmor %vm1311_vm5, %vm1312_vm4  ;;  %vm1321_vm8 = vweird.f32 %v2642_v15 }
 0x22b   : > { %v1339_v12 = vmul.f32 %v1154_v4, %v2271_v32  ;;  %1456 = vst.msk [vmem:[%s2335_s24 + $0xd8] sm:$0xff] %vm645_vm2, %v1424_v16  ;;  %v1294_v52 = vsel %vm1293_vm15, %v1669_v0, %v1290_v14  ;;  %v1307_v47 = vmul.f32 %v1673_v40, %v1306_v26  ;;  %v1675_v49 = vpop.eup %1674 }
 0x22c   : > { %v1298_v29 = vmul.f32 0.5, %v1297_v20  ;;  %v1353_v6 = vmul.f32 %v1294_v52, %v2274_v13  ;;  %v1316_v41 = vmul.f32 %v1675_v49, %v2642_v15  ;;  %vm1322_vm7 = vweird.f32 %v1675_v49 }
 0x22d   : > { %v1375_v37 = vmul.f32 %v2313_v53, %v1339_v12  ;;  %v1308_v36 = vmul.f32 0.5, %v1307_v47  ;;  %vm1323_vm9 = vmor %vm1321_vm8, %vm1322_vm7 }
 0x22e   : > { %v1299_v62 = vsub.f32 1.5, %v1298_v29  ;;  %v1389_v35 = vmul.f32 %v2313_v53, %v1353_v6  ;;  %v1317_v58 = vmul.f32 %v1675_v49, %v1316_v41 }
 0x22f   : > { %v1411_v32 = vadd.f32 %v2321_v61, %v1375_v37  ;;  %v1309_v23 = vsub.f32 1.5, %v1308_v36 }
 0x230   : > { %v1300_v5 = vmul.f32 %v1671_v38, %v1299_v62  ;;  %v1425_v13 = vadd.f32 %v2321_v61, %v1389_v35  ;;  %v1318_v53 = vmul.f32 0.5, %v1317_v58 }
 0x231   : > { %1443 = vst.msk [vmem:[%s2335_s24 + $0x70] sm:$0xff] %vm645_vm2, %v1411_v32  ;;  %v1310_v56 = vmul.f32 %v1673_v40, %v1309_v23 }
 0x232   : > { %v1304_v25 = vsel %vm1303_vm3, %v1671_v38, %v1300_v5  ;;  %1457 = vst.msk [vmem:[%s2335_s24 + $0xe0] sm:$0xff] %vm645_vm2, %v1425_v13  ;;  %v1319_v19 = vsub.f32 1.5, %v1318_v53 }
 0x233   : > { %v1354_v17 = vmul.f32 %v1304_v25, %v2289_v1  ;;  %v1314_v44 = vsel %vm1313_vm6, %v1673_v40, %v1310_v56  ;;  %v1677_v1 = vld [vmem:[%s2696_s4] ss:$0 sm:$0xff] }
 0x234   : > { %v1355_v61 = vmul.f32 %v1314_v44, %v2286_v43  ;;  %v1320_v24 = vmul.f32 %v1675_v49, %v1319_v19 }
 0x235   : > { %v1390_v22 = vmul.f32 %v1676_v2, %v1354_v17 }
 0x236   : > { %v1391_v39 = vmul.f32 %v1676_v2, %v1355_v61  ;;  %v1324_v0 = vsel %vm1323_vm9, %v1675_v49, %v1320_v24 }
 0x237   : > { %v1426_v31 = vadd.f32 %v1677_v1, %v1390_v22  ;;  %v1356_v21 = vmul.f32 %v1324_v0, %v2292_v33 }
 0x238   : > { %v1427_v45 = vadd.f32 %v1677_v1, %v1391_v39 }
 0x239   : > { %1458 = vst.msk [vmem:[%s2335_s24 + $0xe8] sm:$0xff] %vm645_vm2, %v1426_v31  ;;  %v1392_v43 = vmul.f32 %v1676_v2, %v1356_v21 }
 0x23a   : > { %1459 = vst.msk [vmem:[%s2335_s24 + $0xf0] sm:$0xff] %vm645_vm2, %v1427_v45 }
 0x23b   : > { %v1428_v46 = vadd.f32 %v1677_v1, %v1392_v43 }
 0x23d   : > { %1460 = vst.msk [vmem:[%s2335_s24 + $0xf8] sm:$0xff] %vm645_vm2, %v1428_v46 }
 0x23e PF: > { %s15_s18 = sadd.s32 1, %s1684_s18  }
 0x23f   : > { %p12_p4 = scmp.ge.s32.totalorder %s15_s18, 4  }
 0x241   :  { %14 = sbr.rel (!%p12_p4) target bundleno = 1 (0x1), region = 70 }

</bundles_post_ra>
